<compile_context>
chip_gen: v7x
topology: tpu7x:2x2x1
jax: 0.10.0
libtpu: 0.0.40
codegen_flags: <defaults>
</compile_context>

<pallas_src>
import jax
import jax.numpy as jnp
from jax.experimental import pallas as pl
from jax.experimental.pallas import tpu as pltpu


def _conv1x1_kernel(w_ref, x_ref, o_ref):
    # w_ref: [co_blk, C_in], x_ref: [C_in, M], o_ref: [co_blk, M].
    # Standard contraction (no transposed RHS) -> straight MXU weight load.
    o_ref[...] = jnp.dot(
        w_ref[...], x_ref[...], preferred_element_type=jnp.float32
    ).astype(o_ref.dtype)


def conv2d_1x1_pallas(x_nchw, weight, *, use_bf16=True, co_block=128):
    """1x1 conv, stride 1, no bias.

    x_nchw: [N, C_in, H, W]
    weight: [C_out, C_in, 1, 1]
    returns: [N, C_out, H, W] (same dtype as x_nchw; f32 here)
    """
    N, C_in, H, W = x_nchw.shape
    C_out = weight.shape[0]
    assert weight.shape == (C_out, C_in, 1, 1)

    M = N * H * W
    out_dtype = x_nchw.dtype

    # NCHW with the channel axis leading the flattened batch*spatial axis.
    # For N == 1 this transpose only moves a size-1 axis -> free bitcast.
    x2d = jnp.transpose(x_nchw, (1, 0, 2, 3)).reshape(C_in, M)
    w2d = weight.reshape(C_out, C_in)  # free view, no transpose

    if use_bf16:
        # bf16 MXU feed, f32 accumulation; output stays in out_dtype (f32).
        x2d = x2d.astype(jnp.bfloat16)
        w2d = w2d.astype(jnp.bfloat16)

    # C_out blocking (384 = 3 x 128): legal block shapes and lets v7x shard
    # the grid across its two TensorCores. Fall back to a single block if
    # C_out is not a multiple of co_block.
    if C_out % co_block != 0:
        co_block = C_out
    n_blocks = C_out // co_block

    elem = jnp.dtype(x2d.dtype).itemsize
    cost = pl.CostEstimate(
        flops=2 * M * C_in * C_out,
        transcendentals=0,
        bytes_accessed=(M * C_in + C_out * C_in) * elem
        + C_out * M * jnp.dtype(out_dtype).itemsize,
    )

    out2d = pl.pallas_call(
        _conv1x1_kernel,
        out_shape=jax.ShapeDtypeStruct((C_out, M), out_dtype),
        grid=(n_blocks,),
        in_specs=[
            # Weight block: (128, 2304) -> sublane mult of 8, lane mult of 128.
            pl.BlockSpec((co_block, C_in), lambda i: (i, 0)),
            # Activations: full extent (2304, 49); same block every step, so
            # Pallas keeps it resident (no re-DMA across grid iterations).
            pl.BlockSpec((C_in, M), lambda i: (0, 0)),
        ],
        out_specs=pl.BlockSpec((co_block, M), lambda i: (i, 0)),
        compiler_params=pltpu.CompilerParams(
            dimension_semantics=("parallel",),
        ),
        cost_estimate=cost,
    )(w2d, x2d)

    # [C_out, N*H*W] -> [N, C_out, H, W]; free (bitcast) for N == 1.
    return jnp.transpose(out2d.reshape(C_out, N, H, W), (1, 0, 2, 3))


if __name__ == "__main__":
    key = jax.random.PRNGKey(0)
    kx, kw = jax.random.split(key)

    # Shapes fixed by the module: Conv2d(2304, 384, 1x1), input [1, 2304, 7, 7].
    x = jax.random.normal(kx, (1, 2304, 7, 7), dtype=jnp.float32)
    # Deterministic synthetic weight (Kaiming-ish scale).
    w = jax.random.normal(kw, (384, 2304, 1, 1), dtype=jnp.float32) * (1.0 / 2304.0) ** 0.5

    y = conv2d_1x1_pallas(x, w)
    y = jax.block_until_ready(y)
    assert y.shape == (1, 384, 7, 7), y.shape

    # Sanity check against plain f32 JAX 1x1-conv-as-contraction.
    # Tolerance is loosened because the MXU feed is bf16 (accumulation stays f32).
    y_ref = jnp.einsum("nchw,oc->nohw", x, w.reshape(384, 2304))
    max_err = float(jnp.max(jnp.abs(y - y_ref)))
    assert jnp.allclose(y, y_ref, atol=3e-2, rtol=3e-2), max_err

    print("KERNEL_OK")
</pallas_src>

<mosaic_0001>
module attributes {stable_mosaic.version = 11 : i64} {
  func.func @_conv1x1_kernel(%arg0: i32, %arg1: memref<128x2304xbf16, #tpu.memory_space<vmem>>, %arg2: memref<2304x49xbf16, #tpu.memory_space<vmem>>, %arg3: memref<128x49xf32, #tpu.memory_space<vmem>>) attributes {dimension_semantics = [#tpu.dimension_semantics<parallel>], iteration_bounds = array<i64: 3>, scalar_prefetch = 0 : i64, scratch_operands = 0 : i64, tpu.core_type = #tpu.core_type<tc>, window_params = [{transform_indices = @transform_0, window_bounds = array<i64: 128, 2304>}, {pipeline_mode = #tpu.pipeline_mode<synchronous>, transform_indices = @transform_1, window_bounds = array<i64: 2304, 49>}, {transform_indices = @transform_2, window_bounds = array<i64: 128, 49>}]} {
    %c0 = arith.constant 0 : index
    %c0_0 = arith.constant 0 : index
    %0 = vector.load %arg1[%c0, %c0_0] : memref<128x2304xbf16, #tpu.memory_space<vmem>>, vector<128x2304xbf16>
    %c0_1 = arith.constant 0 : index
    %c0_2 = arith.constant 0 : index
    %1 = vector.load %arg2[%c0_1, %c0_2] : memref<2304x49xbf16, #tpu.memory_space<vmem>>, vector<2304x49xbf16>
    %cst = arith.constant dense<0.000000e+00> : vector<128x49xf32>
    %2 = tpu.matmul %0, %1, %cst {dimension_numbers = #tpu.dot_dimension_numbers<[1], [0], [0], [1], [0, 0, 1, 1], [], []>} : vector<128x2304xbf16>, vector<2304x49xbf16>, vector<128x49xf32> -> vector<128x49xf32>
    %c0_3 = arith.constant 0 : index
    %c0_4 = arith.constant 0 : index
    %3 = vector.load %arg3[%c0_3, %c0_4] : memref<128x49xf32, #tpu.memory_space<vmem>>, vector<128x49xf32>
    tpu.vector_store %arg3[%c0_3, %c0_4], %2 {strides = array<i32>} : memref<128x49xf32, #tpu.memory_space<vmem>>, vector<128x49xf32>,
    return
  }
  func.func @transform_0(%arg0: i32) -> (i32, i32) {
    %c0_i32 = arith.constant 0 : i32
    %c0_i32_0 = arith.constant 0 : i32
    return %arg0, %c0_i32 : i32, i32
  }
  func.func @transform_1(%arg0: i32) -> (i32, i32) {
    %c0_i32 = arith.constant 0 : i32
    %c0_i32_0 = arith.constant 0 : i32
    %c0_i32_1 = arith.constant 0 : i32
    return %c0_i32, %c0_i32_0 : i32, i32
  }
  func.func @transform_2(%arg0: i32) -> (i32, i32) {
    %c0_i32 = arith.constant 0 : i32
    %c0_i32_0 = arith.constant 0 : i32
    return %arg0, %c0_i32 : i32, i32
  }
}

</mosaic_0001>

<bundles_post_ra>
// kernel: tpu_custom_call.1
= control target key start
LH: loop header
LB: loop body
LE: loop exit
PB: predicated region body
PF: predicated region fallthrough
CT: control target
= control target key end

     0   :  { %7 = vsyncpa [#allocation3], 0  ;;  %s5432_s0 = inlined_call_operand.hbm [shape: bf16[384,2304], index: 0, kind: input, shape index: {}]   ;;  %s5433_s1 = inlined_call_operand.vmem [shape: bf16[2304,49], index: 1, kind: input, shape index: {}]   ;;  %s5434_s2 = inlined_call_operand.vmem [shape: f32[384,49], index: 2, kind: output, shape index: {}]  }
   0x1   :  { %9 = vsyncpa [#allocation3 + $0x1], 0  ;;  %s4521_s9 = smov 0   ;;  %s4523_s10 = smov 0  }
   0x2   :  { %s4525_s11 = smov 0   ;;  %s4527_s12 = smov 0  }
   0x3 LB: > { %s3141_s13 = sadd.s32 4294967295, %s4501_s12   ;;  %s4541_s14 = sadd.s32 1, %s4501_s12   ;;  %s4501_s12 = sphi %s4527_s12, %s5441_s12   ;;  %s4497_s11 = sphi %s4525_s11, %s5440_s11   ;;  %s4493_s10 = sphi %s4523_s10, %s5439_s10   ;;  %s4489_s9 = sphi %s4521_s9, %s5438_s9  }
   0x4   : > { %s19_s15 = ssub.s32 %s4501_s12, %s4541_s14  ;;  %s22_s16 = sadd.s32 1, %s4497_s11 }
   0x5   : > { %p20_p0 = scmp.eq.s32.totalorder %s19_s15, 0  ;;  %p29_p1 = scmp.ne.s32.totalorder %s4497_s11, %s4493_s10 }
   0x6   : > { %p30_p2 = scmp.eq.s32.totalorder %s4501_s12, 0  ;;  %p35_p3 = scmp.ne.s32.totalorder %s4493_s10, %s4489_s9 }
   0x7   : > { %s4551_s17 = scalar_select %p20_p0, %s4497_s11, %s22_s16  }
   0x8   : > { %p31_p4 = por %p30_p2, %p29_p1  ;;  %p36_p5 = scmp.eq.s32.totalorder %s3141_s13, 0 }
   0x9   : > { %p4042_p6 = scmp.lt.s32.totalorder %s4501_s12, 3  ;;  %s109_s19 = sand.u32 1, %s4497_s11  }
   0xa   : > { %p4556_p7 = por %p36_p5, %p35_p3  ;;  %s4033_s20 = smul.u32 1152, %s109_s19 }
   0xb   : > { %s4034_s21 = smul.u32 18432, %s4501_s12  ;;  %p4562_p8 = pnand %p4042_p6, %p31_p4 }
   0xc   : > { %s113_s26 = scalar_lea.vmem [#allocation2], %s4033_s20  ;;  %s4574_s28 = scalar_lea.sflag [#allocation3], %s109_s19 }
   0xd   : > { %s4569_s25 = scalar_lea.hbm %s5432_s0, %s4034_s21  ;;  %s121_s27 = sshll.u32 %s113_s26, 4  ;;  %s4571_s27 = int_to_ptr.vmem [resolvable:$true] %s121_s27 }
   0xe   : > { %s4437_s29 = scalar_lea.hbm %s4569_s25, 18432  ;;  %p4439_p11 = pneg %p4562_p8 }
   0xf   : > { %p4438_p10 = scmp.ne.s32.totalorder %s4569_s25, %s4437_s29  ;;  %s4442_s4 = scalar_lea.hbm %s5432_s0, 55296 }
  0x10   : > { %p4443_p0 = scmp.lt.u32.totalorder %s4569_s25, %s5432_s0  ;;  %p4444_p1 = scmp.lt.u32.totalorder %s4442_s4, %s4437_s29 }
  0x11   : > { %p4440_p12 = pnand %p4439_p11, %p4438_p10  ;;  %p4446_p3 = scmp.lt.u32.totalorder %s4437_s29, %s4569_s25 }
  0x12   : > { %p4445_p2 = por %p4444_p1, %p4443_p0 }
  0x13   : > { %p4441_p13 = pneg %p4440_p12 }
  0x14   : > { %p4447_p4 = por %p4446_p3, %p4445_p2 }
  0x16   : > { %p4448_p5 = pnand %p4447_p4, %p4441_p13 }
  0x18   : > { %4451 = shalt.err (!%p4448_p5)
}
  0x19   : > { %s4452_s7 = scalar_lea.vmem %s4571_s27, 18432  ;;  %s4503_s8 = smov [#allocation2]  }
  0x1a   : > { %p4453_p6 = scmp.ne.s32.totalorder %s4571_s27, %s4452_s7  ;;  %s4457_s9 = sshll.u32 %s4503_s8, 4  ;;  %s4458_s9 = int_to_ptr.vmem [resolvable:$false] %s4457_s9 }
  0x1b   : > { %s4459_s15 = scalar_lea.vmem %s4458_s9, 36864  ;;  %p4460_p9 = scmp.lt.s32.totalorder %s4571_s27, %s4458_s9 }
  0x1c   : > { %p4455_p10 = pnand %p4453_p6, %p4439_p11  ;;  %p4461_p0 = scmp.lt.s32.totalorder %s4459_s15, %s4452_s7 }
  0x1e   : > { %p4456_p12 = pneg %p4455_p10  ;;  %p4462_p1 = por %p4461_p0, %p4460_p9 }
  0x20   : > { %p4463_p2 = pnand %p4462_p1, %p4456_p12 }
  0x22   : > { %4466 = shalt.err (!%p4463_p2)
}
  0x23   : > { %s4504_s16 = smov 1152   ;;  %s4505_s19 = smov 72  }
  0x24   : > { %4041 = dma.hbm_to_vmem [thread:$0]  (!%p4562_p8), %s4569_s25, 18432, %s4571_s27, %s4574_s28, %s4504_s16, %s4504_s16, %s4505_s19  }
  0x25   : > { %p129_p11 = scmp.lt.s32.totalorder %s4501_s12, 4  ;;  %p5437_p13 = scmp.ge.s32.totalorder %s4501_s12, 1 }
  0x27   : > { %p130_p3 = pnand %p5437_p13, %p129_p11 }
  0x28   : > { %s135_s20 = sand.u32 (!%p130_p3), 1, %s4493_s10  }
  0x29   : > { %133 = sbr.rel (%p130_p3) target bundleno = 584 (0x248), region = 28  ;;  %s136_s23 = scalar_lea.sflag (!%p130_p3), [#allocation3], %s135_s20 }
  0x2a   : > { %s4035_s21 = smul.u32 (!%p130_p3), 1152, %s135_s20 }
  0x2c   : > { %s4606_s24 = scalar_lea.vmem (!%p130_p3), [#allocation2], %s4035_s21 }
  0x30   : > { %4484 = dma.done.wait (%p4556_p7), %s136_s23, 18432  }
  0x31   : > { %4486 = vsyncadd (%p4556_p7), %s136_s23, 4294948864  ;;  %v4077_v0 = vld [vmem:[%s5433_s1 + $0x40] sm:$0xff]   ;;  %v4079_v2 = vld [vmem:[%s5433_s1 + $0x48] sm:$0xff]   ;;  %vm3057_vm0 = vcmask 400384  }
  0x32   : > { %v4078_v1 = vld [vmem:[%s5433_s1] sm:$0xff]   ;;  %3441 = vmatprep.subr.bf16.mxu0 %v4077_v0  ;;  %4017 = vmatprep.subr.bf16.mxu1 %v4077_v0  ;;  %v4080_v3 = vld [vmem:[%s5433_s1 + $0x8] sm:$0xff]   ;;  %v4081_v4 = vld [vmem:[%s5433_s1 + $0x50] sm:$0xff]  }
  0x33   : > { %3442 = vmatpush3.bf16.msra.mxu0 %v4078_v1  ;;  %4025 = vmatpush3.bf16.msra.mxu1 %v4078_v1  ;;  %v4082_v5 = vld [vmem:[%s5433_s1 + $0x10] sm:$0xff]   ;;  %v4083_v6 = vld [vmem:[%s5433_s1 + $0x58] sm:$0xff]   ;;  %v4085_v8 = vld [vmem:[%s5433_s1 + $0x60] sm:$0xff]  }
  0x34   : > { %3443 = vmatprep.subr.bf16.mxu0 %v4079_v2  ;;  %4018 = vmatprep.subr.bf16.mxu1 %v4079_v2  ;;  %v4084_v7 = vld [vmem:[%s5433_s1 + $0x18] sm:$0xff]   ;;  %v4086_v9 = vld [vmem:[%s5433_s1 + $0x20] sm:$0xff]   ;;  %v4087_v10 = vld [vmem:[%s5433_s1 + $0x68] sm:$0xff]  }
  0x35   : > { %v4095_v11 = vld [vmem:[%s4606_s24 + $0x4] ss:$72 sps:$4 sm:$0xff]   ;;  %v4089_v14 = vld [vmem:[%s5433_s1 + $0x70] sm:$0xff]   ;;  %v4091_v16 = vld [vmem:[%s5433_s1 + $0x78] sm:$0xff]  }
  0x36   : > { %v4098_v12 = vld [vmem:[%s4606_s24 + $0x244] ss:$72 sps:$4 sm:$0xff]   ;;  %2216 = vmatprep.mubr.bf16.mxu0 %v4095_v11  ;;  %v4090_v15 = vld [vmem:[%s5433_s1 + $0x30] sm:$0xff]   ;;  %v4092_v17 = vld [vmem:[%s5433_s1 + $0x38] sm:$0xff]  }
  0x37   : > { %3444 = vmatpush3.bf16.msra.mxu0 %v4080_v3  ;;  %4026 = vmatpush3.bf16.msra.mxu1 %v4080_v3  ;;  %v4088_v13 = vld [vmem:[%s5433_s1 + $0x28] sm:$0xff]   ;;  %v4099_v20 = vld [vmem:[%s5433_s1 + $0xc0] sm:$0xff]   ;;  %v4107_v26 = vld [vmem:[%s4606_s24 + $0x94] ss:$72 sps:$4 sm:$0xff]  }
  0x38   : > { %3445 = vmatprep.subr.bf16.mxu0 %v4081_v4  ;;  %4019 = vmatprep.subr.bf16.mxu1 %v4081_v4  ;;  %v4093_v18 = vld [vmem:[%s4606_s24] ss:$72 sps:$4 sm:$0xff]   ;;  %v4109_v28 = vld [vmem:[%s4606_s24 + $0x2d4] ss:$72 sps:$4 sm:$0xff]   ;;  %v4111_v31 = vld [vmem:[%s4606_s24 + $0x90] ss:$72 sps:$4 sm:$0xff]  }
  0x39   : > { %2248 = vmatprep.mubr.bf16.mxu1 %v4098_v12  ;;  %v4096_v19 = vld [vmem:[%s4606_s24 + $0x240] ss:$72 sps:$4 sm:$0xff]   ;;  %v4113_v30 = vld [vmem:[%s5433_s1 + $0xd0] sm:$0xff]   ;;  %v4117_v36 = vld [vmem:[%s5433_s1 + $0xd8] sm:$0xff]  }
  0x3a   : > { %v4100_v21 = vld [vmem:[%s5433_s1 + $0x140] sm:$0xff]   ;;  %v4103_v24 = vld [vmem:[%s5433_s1 + $0xc8] sm:$0xff]   ;;  %v4114_v32 = vld [vmem:[%s5433_s1 + $0x150] sm:$0xff]  }
  0x3b   : > { %3446 = vmatpush3.bf16.msra.mxu0 %v4082_v5  ;;  %4027 = vmatpush3.bf16.msra.mxu1 %v4082_v5  ;;  %v4101_v22 = vld [vmem:[%s5433_s1 + $0x80] sm:$0xff]   ;;  %v4104_v25 = vld [vmem:[%s5433_s1 + $0x148] sm:$0xff]   ;;  %v4112_v33 = vld [vmem:[%s4606_s24 + $0x2d0] ss:$72 sps:$4 sm:$0xff]  }
  0x3c   : > { %3447 = vmatprep.subr.bf16.mxu0 %v4083_v6  ;;  %4020 = vmatprep.subr.bf16.mxu1 %v4083_v6  ;;  %v4102_v23 = vld [vmem:[%s5433_s1 + $0x100] sm:$0xff]   ;;  %v4105_v27 = vld [vmem:[%s5433_s1 + $0x88] sm:$0xff]   ;;  %v4115_v34 = vld [vmem:[%s5433_s1 + $0x90] sm:$0xff]  }
  0x3d   : > { %v4106_v29 = vld [vmem:[%s5433_s1 + $0x108] sm:$0xff]   ;;  %v4116_v35 = vld [vmem:[%s5433_s1 + $0x110] sm:$0xff]   ;;  %v4118_v37 = vld [vmem:[%s5433_s1 + $0x158] sm:$0xff]  }
  0x3e   : > { %v4121_v38 = vld [vmem:[%s4606_s24 + $0x124] ss:$72 sps:$4 sm:$0xff]   ;;  %v4119_v39 = vld [vmem:[%s5433_s1 + $0x98] sm:$0xff]   ;;  %v4125_v43 = vld [vmem:[%s4606_s24 + $0x120] ss:$72 sps:$4 sm:$0xff]  }
  0x3f   : > { %3448 = vmatpush3.bf16.msra.mxu0 %v4084_v7  ;;  %4028 = vmatpush3.bf16.msra.mxu1 %v4084_v7  ;;  %v4123_v40 = vld [vmem:[%s4606_s24 + $0x364] ss:$72 sps:$4 sm:$0xff]   ;;  %v4120_v41 = vld [vmem:[%s5433_s1 + $0x118] sm:$0xff]   ;;  %v4126_v44 = vld [vmem:[%s4606_s24 + $0x360] ss:$72 sps:$4 sm:$0xff]  }
  0x40   : > { %3449 = vmatprep.subr.bf16.mxu0 %v4085_v8  ;;  %4021 = vmatprep.subr.bf16.mxu1 %v4085_v8  ;;  %v4127_v42 = vld [vmem:[%s5433_s1 + $0xe0] sm:$0xff]   ;;  %v4131_v48 = vld [vmem:[%s5433_s1 + $0xe8] sm:$0xff]   ;;  %v4135_v50 = vld [vmem:[%s4606_s24 + $0x1b4] ss:$72 sps:$4 sm:$0xff]  }
  0x41   : > { %v4128_v45 = vld [vmem:[%s5433_s1 + $0x160] sm:$0xff]   ;;  %v4132_v49 = vld [vmem:[%s5433_s1 + $0x168] sm:$0xff]   ;;  %v4137_v51 = vld [vmem:[%s4606_s24 + $0x3f4] ss:$72 sps:$4 sm:$0xff]  }
  0x42   : > { %v4129_v46 = vld [vmem:[%s5433_s1 + $0xa0] sm:$0xff]   ;;  %v4133_v52 = vld [vmem:[%s5433_s1 + $0xa8] sm:$0xff]   ;;  %v4141_v54 = vld [vmem:[%s5433_s1 + $0xf0] sm:$0xff]  }
  0x43   : > { %3450 = vmatpush3.bf16.msra.mxu0 %v4086_v9  ;;  %4029 = vmatpush3.bf16.msra.mxu1 %v4086_v9  ;;  %v4130_v47 = vld [vmem:[%s5433_s1 + $0x120] sm:$0xff]   ;;  %v4134_v53 = vld [vmem:[%s5433_s1 + $0x128] sm:$0xff]   ;;  %v4139_v55 = vld [vmem:[%s4606_s24 + $0x1b0] ss:$72 sps:$4 sm:$0xff]  }
  0x44   : > { %3451 = vmatprep.subr.bf16.mxu0 %v4087_v10  ;;  %4022 = vmatprep.subr.bf16.mxu1 %v4087_v10  ;;  %v4140_v56 = vld [vmem:[%s4606_s24 + $0x3f0] ss:$72 sps:$4 sm:$0xff]   ;;  %v4151_v0 = vld [vmem:[%s4606_s24 + $0xc] ss:$72 sps:$4 sm:$0xff]   ;;  %v4155_v4 = vld [vmem:[%s5433_s1 + $0x1c0] sm:$0xff]  }
  0x45   : > { %v4142_v57 = vld [vmem:[%s5433_s1 + $0x170] sm:$0xff]   ;;  %v4145_v60 = vld [vmem:[%s5433_s1 + $0xf8] sm:$0xff]   ;;  %v4156_v5 = vld [vmem:[%s5433_s1 + $0x180] sm:$0xff]  }
  0x46   : > { %v4143_v58 = vld [vmem:[%s5433_s1 + $0xb0] sm:$0xff]   ;;  %v4146_v61 = vld [vmem:[%s5433_s1 + $0x178] sm:$0xff]   ;;  %v4157_v6 = vld [vmem:[%s5433_s1 + $0x240] sm:$0xff]  }
  0x47   : > { %3452 = vmatpush3.bf16.msra.mxu0 %v4088_v13  ;;  %4030 = vmatpush3.bf16.msra.mxu1 %v4088_v13  ;;  %v4144_v59 = vld [vmem:[%s5433_s1 + $0x130] sm:$0xff]   ;;  %v4147_v62 = vld [vmem:[%s5433_s1 + $0xb8] sm:$0xff]   ;;  %v4158_v7 = vld [vmem:[%s5433_s1 + $0x200] sm:$0xff]  }
  0x48   : > { %3453 = vmatprep.subr.bf16.mxu0 %v4089_v14  ;;  %4023 = vmatprep.subr.bf16.mxu1 %v4089_v14  ;;  %v4148_v63 = vld [vmem:[%s5433_s1 + $0x138] sm:$0xff]   ;;  %v4149_v1 = vld [vmem:[%s4606_s24 + $0x8] ss:$72 sps:$4 sm:$0xff]   ;;  %v4161_v9 = vld [vmem:[%s4606_s24 + $0xa4] ss:$72 sps:$4 sm:$0xff]  }
  0x49   : > { %v4152_v2 = vld [vmem:[%s4606_s24 + $0x10] ss:$72 sps:$4 sm:$0xff]   ;;  %v4154_v3 = vld [vmem:[%s4606_s24 + $0x14] ss:$72 sps:$4 sm:$0xff]   ;;  %v4164_v11 = vld [vmem:[%s4606_s24 + $0xa0] ss:$72 sps:$4 sm:$0xff]  }
  0x4a   : > { %v4159_v8 = vld [vmem:[%s4606_s24 + $0x9c] ss:$72 sps:$4 sm:$0xff]   ;;  %v4163_v10 = vld [vmem:[%s4606_s24 + $0x98] ss:$72 sps:$4 sm:$0xff]   ;;  %v4165_v12 = vld [vmem:[%s5433_s1 + $0x1c8] sm:$0xff]  }
  0x4b   : > { %3454 = vmatpush3.bf16.msra.mxu0 %v4090_v15  ;;  %4031 = vmatpush3.bf16.msra.mxu1 %v4090_v15  ;;  %v4166_v13 = vld [vmem:[%s5433_s1 + $0x188] sm:$0xff]  }
  0x4c   : > { %3455 = vmatprep.subr.bf16.mxu0 %v4091_v16  ;;  %4024 = vmatprep.subr.bf16.mxu1 %v4091_v16  ;;  %v4167_v14 = vld [vmem:[%s5433_s1 + $0x248] sm:$0xff]  }
  0x4d   : > { %v4168_v15 = vld [vmem:[%s5433_s1 + $0x208] sm:$0xff]  }
  0x4e   : > { %v4169_v16 = vld [vmem:[%s4606_s24 + $0x12c] ss:$72 sps:$4 sm:$0xff]  }
  0x4f   : > { %3456 = vmatpush3.bf16.msra.mxu0 %v4092_v17  ;;  %4032 = vmatpush3.bf16.msra.mxu1 %v4092_v17  ;;  %v4171_v17 = vld [vmem:[%s4606_s24 + $0x134] ss:$72 sps:$4 sm:$0xff]  }
  0x50   : > { %3505 = vmatprep.subr.bf16.mxu1 %v4099_v20  ;;  %3569 = vmatprep.subr.bf16.mxu0 %v4100_v21  ;;  %v4174_v20 = vld [vmem:[%s4606_s24 + $0x130] ss:$72 sps:$4 sm:$0xff]  }
  0x51   : > { %v4176_v21 = vld [vmem:[%s5433_s1 + $0x190] sm:$0xff]  }
  0x52   : > { %2217 = vmatmul.mubr.bf16.vlgmr.msra.gmra.mrb[0].mxu0 %v4093_v18  ;;  %2249 = vmatmul.mubr.bf16.vlgmr.msra.gmra.mrb[0].mxu1 %v4096_v19  ;;  %v4175_v18 = vld [vmem:[%s5433_s1 + $0x1d0] sm:$0xff]  }
  0x53   : > { %3506 = vmatpush3.bf16.msra.mxu1 %v4101_v22  ;;  %3570 = vmatpush3.bf16.msra.mxu0 %v4102_v23  ;;  %v4173_v19 = vld [vmem:[%s4606_s24 + $0x128] ss:$72 sps:$4 sm:$0xff]  }
  0x54   : > { %3507 = vmatprep.subr.bf16.mxu1 %v4103_v24  ;;  %3571 = vmatprep.subr.bf16.mxu0 %v4104_v25  ;;  %v4177_v22 = vld [vmem:[%s5433_s1 + $0x250] sm:$0xff]   ;;  %v4179_v24 = vld [vmem:[%s4606_s24 + $0x1bc] ss:$72 sps:$4 sm:$0xff]  }
  0x55   : > { %2224 = vmatprep.mubr.bf16.mxu0 %v4107_v26  ;;  %2256 = vmatprep.mubr.bf16.mxu1 %v4109_v28  ;;  %v4178_v23 = vld [vmem:[%s5433_s1 + $0x210] sm:$0xff]   ;;  %v4181_v25 = vld [vmem:[%s4606_s24 + $0x1c4] ss:$72 sps:$4 sm:$0xff]   ;;  %v4185_v26 = vld [vmem:[%s5433_s1 + $0x1d8] sm:$0xff]  }
  0x56   : > { %v4183_v28 = vld [vmem:[%s4606_s24 + $0x1b8] ss:$72 sps:$4 sm:$0xff]  }
  0x57   : > { %3508 = vmatpush3.bf16.msra.mxu1 %v4105_v27  ;;  %3572 = vmatpush3.bf16.msra.mxu0 %v4106_v29  ;;  %v4186_v27 = vld [vmem:[%s5433_s1 + $0x198] sm:$0xff]  }
  0x58   : > { %3509 = vmatprep.subr.bf16.mxu1 %v4113_v30  ;;  %3573 = vmatprep.subr.bf16.mxu0 %v4114_v32  ;;  %v4187_v29 = vld [vmem:[%s5433_s1 + $0x258] sm:$0xff]   ;;  %v4189_v32 = vld [vmem:[%s4606_s24 + $0x24c] ss:$72 sps:$4 sm:$0xff]  }
  0x59   : > { %v4188_v30 = vld [vmem:[%s5433_s1 + $0x218] sm:$0xff]  }
  0x5a   : > { %2225 = vmatmul.mubr.bf16.gmra.mrb[4].mxu0 %v4111_v31  ;;  %2257 = vmatmul.mubr.bf16.gmra.mrb[4].mxu1 %v4112_v33  ;;  %v4184_v31 = vld [vmem:[%s4606_s24 + $0x1c0] ss:$72 sps:$4 sm:$0xff]   ;;  %v4191_v33 = vld [vmem:[%s4606_s24 + $0x254] ss:$72 sps:$4 sm:$0xff]  }
  0x5b   : > { %3510 = vmatpush3.bf16.msra.mxu1 %v4115_v34  ;;  %3574 = vmatpush3.bf16.msra.mxu0 %v4116_v35  ;;  %v4195_v34 = vld [vmem:[%s5433_s1 + $0x1e0] sm:$0xff]  }
  0x5c   : > { %3511 = vmatprep.subr.bf16.mxu1 %v4117_v36  ;;  %3575 = vmatprep.subr.bf16.mxu0 %v4118_v37  ;;  %v4196_v35 = vld [vmem:[%s5433_s1 + $0x1a0] sm:$0xff]  }
  0x5d   : > { %2232 = vmatprep.mubr.bf16.mxu0 %v4121_v38  ;;  %2264 = vmatprep.mubr.bf16.mxu1 %v4123_v40  ;;  %v4197_v36 = vld [vmem:[%s5433_s1 + $0x260] sm:$0xff]   ;;  %v4193_v38 = vld [vmem:[%s4606_s24 + $0x248] ss:$72 sps:$4 sm:$0xff]  }
  0x5e   : > { %v4198_v37 = vld [vmem:[%s5433_s1 + $0x220] sm:$0xff]  }
  0x5f   : > { %3512 = vmatpush3.bf16.msra.mxu1 %v4119_v39  ;;  %3576 = vmatpush3.bf16.msra.mxu0 %v4120_v41  ;;  %v4194_v39 = vld [vmem:[%s4606_s24 + $0x250] ss:$72 sps:$4 sm:$0xff]   ;;  %v4199_v40 = vld [vmem:[%s4606_s24 + $0x2dc] ss:$72 sps:$4 sm:$0xff]  }
  0x60   : > { %3513 = vmatprep.subr.bf16.mxu1 %v4127_v42  ;;  %3577 = vmatprep.subr.bf16.mxu0 %v4128_v45  ;;  %v4201_v41 = vld [vmem:[%s4606_s24 + $0x2e4] ss:$72 sps:$4 sm:$0xff]  }
  0x61   : > { %v4205_v42 = vld [vmem:[%s5433_s1 + $0x1e8] sm:$0xff]  }
  0x62   : > { %2233 = vmatmul.mubr.bf16.gmra.mrb[8].mxu0 %v4125_v43  ;;  %2265 = vmatmul.mubr.bf16.gmra.mrb[8].mxu1 %v4126_v44  ;;  %v4206_v43 = vld [vmem:[%s5433_s1 + $0x1a8] sm:$0xff]  }
  0x63   : > { %3514 = vmatpush3.bf16.msra.mxu1 %v4129_v46  ;;  %3578 = vmatpush3.bf16.msra.mxu0 %v4130_v47  ;;  %v4207_v44 = vld [vmem:[%s5433_s1 + $0x268] sm:$0xff]   ;;  %v4203_v46 = vld [vmem:[%s4606_s24 + $0x2d8] ss:$72 sps:$4 sm:$0xff]  }
  0x64   : > { %3515 = vmatprep.subr.bf16.mxu1 %v4131_v48  ;;  %3579 = vmatprep.subr.bf16.mxu0 %v4132_v49  ;;  %v4208_v45 = vld [vmem:[%s5433_s1 + $0x228] sm:$0xff]   ;;  %v4211_v49 = vld [vmem:[%s4606_s24 + $0x374] ss:$72 sps:$4 sm:$0xff]  }
  0x65   : > { %2240 = vmatprep.mubr.bf16.mxu0 %v4135_v50  ;;  %2272 = vmatprep.mubr.bf16.mxu1 %v4137_v51  ;;  %v4204_v47 = vld [vmem:[%s4606_s24 + $0x2e0] ss:$72 sps:$4 sm:$0xff]   ;;  %v4209_v48 = vld [vmem:[%s4606_s24 + $0x36c] ss:$72 sps:$4 sm:$0xff]  }
  0x66   : > { %v4215_v50 = vld [vmem:[%s5433_s1 + $0x1f0] sm:$0xff]  }
  0x67   : > { %3516 = vmatpush3.bf16.msra.mxu1 %v4133_v52  ;;  %3580 = vmatpush3.bf16.msra.mxu0 %v4134_v53  ;;  %v4216_v51 = vld [vmem:[%s5433_s1 + $0x1b0] sm:$0xff]  }
  0x68   : > { %3517 = vmatprep.subr.bf16.mxu1 %v4141_v54  ;;  %3581 = vmatprep.subr.bf16.mxu0 %v4142_v57  ;;  %v4217_v52 = vld [vmem:[%s5433_s1 + $0x270] sm:$0xff]   ;;  %v4219_v57 = vld [vmem:[%s4606_s24 + $0x3fc] ss:$72 sps:$4 sm:$0xff]  }
  0x69   : > { %v4218_v53 = vld [vmem:[%s5433_s1 + $0x230] sm:$0xff]  }
  0x6a   : > { %2241 = vmatmul.mubr.bf16.gmra.mrb[12].mxu0 %v4139_v55  ;;  %2273 = vmatmul.mubr.bf16.gmra.mrb[12].mxu1 %v4140_v56  ;;  %v4213_v54 = vld [vmem:[%s4606_s24 + $0x368] ss:$72 sps:$4 sm:$0xff]   ;;  %v4225_v56 = vld [vmem:[%s5433_s1 + $0x1f8] sm:$0xff]  }
  0x6b   : > { %3518 = vmatpush3.bf16.msra.mxu1 %v4143_v58  ;;  %3582 = vmatpush3.bf16.msra.mxu0 %v4144_v59  ;;  %v4214_v55 = vld [vmem:[%s4606_s24 + $0x370] ss:$72 sps:$4 sm:$0xff]   ;;  %v4221_v58 = vld [vmem:[%s4606_s24 + $0x404] ss:$72 sps:$4 sm:$0xff]  }
  0x6c   : > { %3519 = vmatprep.subr.bf16.mxu1 %v4145_v60  ;;  %3583 = vmatprep.subr.bf16.mxu0 %v4146_v61  ;;  %v4226_v59 = vld [vmem:[%s5433_s1 + $0x1b8] sm:$0xff]  }
  0x6d   : > { %2313 = vmatprep.mubr.bf16.mxu1 %v4151_v0  ;;  %2410 = vmatprep.mubr.bf16.mxu0 %v4154_v3  ;;  %v4227_v60 = vld [vmem:[%s5433_s1 + $0x278] sm:$0xff]   ;;  %v4224_v0 = vld [vmem:[%s4606_s24 + $0x400] ss:$72 sps:$4 sm:$0xff]   ;;  %v4234_v3 = vld [vmem:[%s4606_s24 + $0x24] ss:$72 sps:$4 sm:$0xff]  }
  0x6e   : > { %v4228_v61 = vld [vmem:[%s5433_s1 + $0x238] sm:$0xff]  }
  0x6f   : > { %3520 = vmatpush3.bf16.msra.mxu1 %v4147_v62  ;;  %3584 = vmatpush3.bf16.msra.mxu0 %v4148_v63  ;;  %v4235_v62 = vld [vmem:[%s5433_s1 + $0x2c0] sm:$0xff]  }
  0x70   : > { %3633 = vmatprep.subr.bf16.mxu1 %v4155_v4  ;;  %3697 = vmatprep.subr.bf16.mxu0 %v4157_v6  ;;  %v4223_v63 = vld [vmem:[%s4606_s24 + $0x3f8] ss:$72 sps:$4 sm:$0xff]  }
  0x71   : > { %v4229_v4 = vld [vmem:[%s4606_s24 + $0x18] ss:$72 sps:$4 sm:$0xff]  }
  0x72   : > { %2314 = vmatmul.mubr.bf16.vlgmr.msra.gmra.mrb[16].mxu1 %v4149_v1  ;;  %2411 = vmatmul.mubr.bf16.vlgmr.msra.gmra.mrb[16].mxu0 %v4152_v2  ;;  %v4237_v1 = vld [vmem:[%s5433_s1 + $0x340] sm:$0xff]  }
  0x73   : > { %3634 = vmatpush3.bf16.msra.mxu1 %v4156_v5  ;;  %3698 = vmatpush3.bf16.msra.mxu0 %v4158_v7  ;;  %v4231_v2 = vld [vmem:[%s4606_s24 + $0x1c] ss:$72 sps:$4 sm:$0xff]   ;;  %v4232_v5 = vld [vmem:[%s4606_s24 + $0x20] ss:$72 sps:$4 sm:$0xff]  }
  0x74   : > { %2321 = vmatprep.mubr.bf16.mxu1 %v4159_v8  ;;  %2418 = vmatprep.mubr.bf16.mxu0 %v4161_v9  ;;  %v4236_v6 = vld [vmem:[%s5433_s1 + $0x280] sm:$0xff]   ;;  %v4239_v8 = vld [vmem:[%s4606_s24 + $0xac] ss:$72 sps:$4 sm:$0xff]  }
  0x75   : > { %3635 = vmatprep.subr.bf16.mxu1 %v4165_v12  ;;  %3699 = vmatprep.subr.bf16.mxu0 %v4167_v14  ;;  %v4238_v7 = vld [vmem:[%s5433_s1 + $0x300] sm:$0xff]   ;;  %v4241_v9 = vld [vmem:[%s4606_s24 + $0xb4] ss:$72 sps:$4 sm:$0xff]   ;;  %v4247_v12 = vld [vmem:[%s5433_s1 + $0x348] sm:$0xff]  }
  0x76   : > { %v4255_v14 = vld [vmem:[%s5433_s1 + $0x2d0] sm:$0xff]  }
  0x77   : > { %3636 = vmatpush3.bf16.msra.mxu1 %v4166_v13  ;;  %3700 = vmatpush3.bf16.msra.mxu0 %v4168_v15  ;;  %v4248_v13 = vld [vmem:[%s5433_s1 + $0x308] sm:$0xff]  }
  0x78   : > { %3637 = vmatprep.subr.bf16.mxu1 %v4175_v18  ;;  %3701 = vmatprep.subr.bf16.mxu0 %v4177_v22  ;;  %v4243_v15 = vld [vmem:[%s4606_s24 + $0xa8] ss:$72 sps:$4 sm:$0xff]   ;;  %v4249_v18 = vld [vmem:[%s4606_s24 + $0x13c] ss:$72 sps:$4 sm:$0xff]  }
  0x79   : > { %v4265_v22 = vld [vmem:[%s5433_s1 + $0x2d8] sm:$0xff]  }
  0x7a   : > { %2322 = vmatmul.mubr.bf16.gmra.mrb[20].mxu1 %v4163_v10  ;;  %2419 = vmatmul.mubr.bf16.gmra.mrb[20].mxu0 %v4164_v11  ;;  %v4245_v10 = vld [vmem:[%s5433_s1 + $0x2c8] sm:$0xff]  }
  0x7b   : > { %2329 = vmatprep.mubr.bf16.mxu1 %v4169_v16  ;;  %2426 = vmatprep.mubr.bf16.mxu0 %v4171_v17  ;;  %v4246_v11 = vld [vmem:[%s5433_s1 + $0x288] sm:$0xff]   ;;  %v4244_v16 = vld [vmem:[%s4606_s24 + $0xb0] ss:$72 sps:$4 sm:$0xff]  }
  0x7c   : > { %3638 = vmatpush3.bf16.msra.mxu1 %v4176_v21  ;;  %3702 = vmatpush3.bf16.msra.mxu0 %v4178_v23  ;;  %v4257_v17 = vld [vmem:[%s5433_s1 + $0x350] sm:$0xff]   ;;  %v4267_v23 = vld [vmem:[%s5433_s1 + $0x358] sm:$0xff]  }
  0x7d   : > { %3639 = vmatprep.subr.bf16.mxu1 %v4185_v26  ;;  %3703 = vmatprep.subr.bf16.mxu0 %v4187_v29  ;;  %v4258_v21 = vld [vmem:[%s5433_s1 + $0x310] sm:$0xff]   ;;  %v4266_v26 = vld [vmem:[%s5433_s1 + $0x298] sm:$0xff]  }
  0x7e   : > { %v4261_v29 = vld [vmem:[%s4606_s24 + $0x1d4] ss:$72 sps:$4 sm:$0xff]  }
  0x80   : > { %3640 = vmatpush3.bf16.msra.mxu1 %v4186_v27  ;;  %3704 = vmatpush3.bf16.msra.mxu0 %v4188_v30  ;;  %v4268_v27 = vld [vmem:[%s5433_s1 + $0x318] sm:$0xff]   ;;  %v4275_v30 = vld [vmem:[%s5433_s1 + $0x2e0] sm:$0xff]  }
  0x81   : > { %3641 = vmatprep.subr.bf16.mxu1 %v4195_v34  ;;  %3705 = vmatprep.subr.bf16.mxu0 %v4197_v36  ;;  %v4263_v34 = vld [vmem:[%s4606_s24 + $0x1c8] ss:$72 sps:$4 sm:$0xff]  }
  0x82   : > { %2330 = vmatmul.mubr.bf16.gmra.mrb[24].mxu1 %v4173_v19  ;;  %2427 = vmatmul.mubr.bf16.gmra.mrb[24].mxu0 %v4174_v20  ;;  %v4251_v19 = vld [vmem:[%s4606_s24 + $0x144] ss:$72 sps:$4 sm:$0xff]   ;;  %v4256_v20 = vld [vmem:[%s5433_s1 + $0x290] sm:$0xff]  }
  0x83   : > { %2337 = vmatprep.mubr.bf16.mxu1 %v4179_v24  ;;  %2434 = vmatprep.mubr.bf16.mxu0 %v4181_v25  ;;  %v4253_v24 = vld [vmem:[%s4606_s24 + $0x138] ss:$72 sps:$4 sm:$0xff]   ;;  %v4285_v36 = vld [vmem:[%s5433_s1 + $0x2e8] sm:$0xff]  }
  0x84   : > { %3642 = vmatpush3.bf16.msra.mxu1 %v4196_v35  ;;  %3706 = vmatpush3.bf16.msra.mxu0 %v4198_v37  ;;  %v4254_v25 = vld [vmem:[%s4606_s24 + $0x140] ss:$72 sps:$4 sm:$0xff]   ;;  %v4264_v35 = vld [vmem:[%s4606_s24 + $0x1d0] ss:$72 sps:$4 sm:$0xff]   ;;  %v4269_v37 = vld [vmem:[%s4606_s24 + $0x25c] ss:$72 sps:$4 sm:$0xff]  }
  0x85   : > { %3643 = vmatprep.subr.bf16.mxu1 %v4205_v42  ;;  %3707 = vmatprep.subr.bf16.mxu0 %v4207_v44  ;;  %v4295_v42 = vld [vmem:[%s5433_s1 + $0x2f0] sm:$0xff]   ;;  %v4274_v44 = vld [vmem:[%s4606_s24 + $0x260] ss:$72 sps:$4 sm:$0xff]  }
  0x88   : > { %3644 = vmatpush3.bf16.msra.mxu1 %v4206_v43  ;;  %3708 = vmatpush3.bf16.msra.mxu0 %v4208_v45  ;;  %v4273_v43 = vld [vmem:[%s4606_s24 + $0x258] ss:$72 sps:$4 sm:$0xff]   ;;  %v4296_v45 = vld [vmem:[%s5433_s1 + $0x2b0] sm:$0xff]  }
  0x89   : > { %3645 = vmatprep.subr.bf16.mxu1 %v4215_v50  ;;  %3709 = vmatprep.subr.bf16.mxu0 %v4217_v52  ;;  %v4305_v50 = vld [vmem:[%s5433_s1 + $0x2f8] sm:$0xff]  }
  0x8a   : > { %2338 = vmatmul.mubr.bf16.gmra.mrb[28].mxu1 %v4183_v28  ;;  %2435 = vmatmul.mubr.bf16.gmra.mrb[28].mxu0 %v4184_v31  ;;  %v4259_v28 = vld [vmem:[%s4606_s24 + $0x1cc] ss:$72 sps:$4 sm:$0xff]   ;;  %v4276_v31 = vld [vmem:[%s5433_s1 + $0x2a0] sm:$0xff]   ;;  %v4307_v52 = vld [vmem:[%s5433_s1 + $0x378] sm:$0xff]  }
  0x8b   : > { %2345 = vmatprep.mubr.bf16.mxu1 %v4189_v32  ;;  %2442 = vmatprep.mubr.bf16.mxu0 %v4191_v33  ;;  %v4277_v32 = vld [vmem:[%s5433_s1 + $0x360] sm:$0xff]  }
  0x8c   : > { %3646 = vmatpush3.bf16.msra.mxu1 %v4216_v51  ;;  %3710 = vmatpush3.bf16.msra.mxu0 %v4218_v53  ;;  %v4278_v33 = vld [vmem:[%s5433_s1 + $0x320] sm:$0xff]   ;;  %v4306_v51 = vld [vmem:[%s5433_s1 + $0x2b8] sm:$0xff]  }
  0x8d   : > { %3647 = vmatprep.subr.bf16.mxu1 %v4225_v56  ;;  %3711 = vmatprep.subr.bf16.mxu0 %v4227_v60  ;;  %v4308_v53 = vld [vmem:[%s5433_s1 + $0x338] sm:$0xff]  }
  0x8e   : > { %v4289_v56 = vld [vmem:[%s4606_s24 + $0x37c] ss:$72 sps:$4 sm:$0xff]   ;;  %v4293_v60 = vld [vmem:[%s4606_s24 + $0x378] ss:$72 sps:$4 sm:$0xff]  }
  0x90   : > { %3648 = vmatpush3.bf16.msra.mxu1 %v4226_v59  ;;  %3712 = vmatpush3.bf16.msra.mxu0 %v4228_v61  ;;  %v4317_v59 = vld [vmem:[%s5433_s1 + $0x440] sm:$0xff]  }
  0x91   : > { %3761 = vmatprep.subr.bf16.mxu1 %v4235_v62  ;;  %3825 = vmatprep.subr.bf16.mxu0 %v4237_v1  ;;  %v4294_v61 = vld [vmem:[%s4606_s24 + $0x380] ss:$72 sps:$4 sm:$0xff]   ;;  %v4299_v62 = vld [vmem:[%s4606_s24 + $0x40c] ss:$72 sps:$4 sm:$0xff]   ;;  %v4304_v1 = vld [vmem:[%s4606_s24 + $0x410] ss:$72 sps:$4 sm:$0xff]  }
  0x92   : > { %2346 = vmatmul.mubr.bf16.gmra.mrb[32].mxu1 %v4193_v38  ;;  %2443 = vmatmul.mubr.bf16.gmra.mrb[32].mxu0 %v4194_v39  ;;  %v4271_v38 = vld [vmem:[%s4606_s24 + $0x264] ss:$72 sps:$4 sm:$0xff]  }
  0x93   : > { %2353 = vmatprep.mubr.bf16.mxu1 %v4199_v40  ;;  %2450 = vmatprep.mubr.bf16.mxu0 %v4201_v41  ;;  %v4286_v39 = vld [vmem:[%s5433_s1 + $0x2a8] sm:$0xff]  }
  0x94   : > { %v4287_v40 = vld [vmem:[%s5433_s1 + $0x368] sm:$0xff]  }
  0x95   : > { %v4288_v41 = vld [vmem:[%s5433_s1 + $0x328] sm:$0xff]  }
  0x9a   : > { %2354 = vmatmul.mubr.bf16.gmra.mrb[36].mxu1 %v4203_v46  ;;  %2451 = vmatmul.mubr.bf16.gmra.mrb[36].mxu0 %v4204_v47  ;;  %v4279_v46 = vld [vmem:[%s4606_s24 + $0x2ec] ss:$72 sps:$4 sm:$0xff]  }
  0x9b   : > { %2361 = vmatprep.mubr.bf16.mxu1 %v4209_v48  ;;  %2458 = vmatprep.mubr.bf16.mxu0 %v4211_v49  ;;  %v4297_v47 = vld [vmem:[%s5433_s1 + $0x370] sm:$0xff]  }
  0x9c   : > { %v4298_v48 = vld [vmem:[%s5433_s1 + $0x330] sm:$0xff]  }
  0x9d   : > { %v4281_v49 = vld [vmem:[%s4606_s24 + $0x2f4] ss:$72 sps:$4 sm:$0xff]  }
  0xa2   : > { %2362 = vmatmul.mubr.bf16.gmra.mrb[40].mxu1 %v4213_v54  ;;  %2459 = vmatmul.mubr.bf16.gmra.mrb[40].mxu0 %v4214_v55  ;;  %v4283_v54 = vld [vmem:[%s4606_s24 + $0x2e8] ss:$72 sps:$4 sm:$0xff]  }
  0xa3   : > { %2369 = vmatprep.mubr.bf16.mxu1 %v4219_v57  ;;  %2466 = vmatprep.mubr.bf16.mxu0 %v4221_v58  ;;  %v4284_v55 = vld [vmem:[%s4606_s24 + $0x2f0] ss:$72 sps:$4 sm:$0xff]   ;;  %v4291_v57 = vld [vmem:[%s4606_s24 + $0x384] ss:$72 sps:$4 sm:$0xff]  }
  0xa4   : > { %v4315_v58 = vld [vmem:[%s5433_s1 + $0x3c0] sm:$0xff]  }
  0xaa   : > { %2370 = vmatmul.mubr.bf16.gmra.mrb[44].mxu1 %v4223_v63  ;;  %2467 = vmatmul.mubr.bf16.gmra.mrb[44].mxu0 %v4224_v0  ;;  %v4301_v63 = vld [vmem:[%s4606_s24 + $0x414] ss:$72 sps:$4 sm:$0xff]   ;;  %v4303_v0 = vld [vmem:[%s4606_s24 + $0x408] ss:$72 sps:$4 sm:$0xff]  }
  0xab   : > { %2507 = vmatprep.mubr.bf16.mxu1 %v4231_v2  ;;  %2604 = vmatprep.mubr.bf16.mxu0 %v4234_v3  ;;  %v4311_v2 = vld [vmem:[%s4606_s24 + $0x2c] ss:$72 sps:$4 sm:$0xff]  }
  0xac   : > { %v4314_v3 = vld [vmem:[%s4606_s24 + $0x34] ss:$72 sps:$4 sm:$0xff]  }
  0xb2   : > { %2508 = vmatmul.mubr.bf16.vlgmr.msra.gmra.mrb[48].mxu1 %v4229_v4  ;;  %2605 = vmatmul.mubr.bf16.vlgmr.msra.gmra.mrb[48].mxu0 %v4232_v5  ;;  %v4309_v4 = vld [vmem:[%s4606_s24 + $0x28] ss:$72 sps:$4 sm:$0xff]  }
  0xb3   : > { %3762 = vmatpush3.bf16.msra.mxu1 %v4236_v6  ;;  %3826 = vmatpush3.bf16.msra.mxu0 %v4238_v7  ;;  %v4312_v5 = vld [vmem:[%s4606_s24 + $0x30] ss:$72 sps:$4 sm:$0xff]   ;;  %v4316_v6 = vld [vmem:[%s5433_s1 + $0x380] sm:$0xff]  }
  0xb4   : > { %2515 = vmatprep.mubr.bf16.mxu1 %v4239_v8  ;;  %2612 = vmatprep.mubr.bf16.mxu0 %v4241_v9  ;;  %v4318_v7 = vld [vmem:[%s5433_s1 + $0x400] sm:$0xff]  }
  0xb5   : > { %3763 = vmatprep.subr.bf16.mxu1 %v4245_v10  ;;  %3827 = vmatprep.subr.bf16.mxu0 %v4247_v12  ;;  %v4319_v8 = vld [vmem:[%s4606_s24 + $0xbc] ss:$72 sps:$4 sm:$0xff]   ;;  %v4325_v10 = vld [vmem:[%s5433_s1 + $0x3c8] sm:$0xff]  }
  0xb6   : > { %v4321_v9 = vld [vmem:[%s4606_s24 + $0xc4] ss:$72 sps:$4 sm:$0xff]  }
  0xb7   : > { %3764 = vmatpush3.bf16.msra.mxu1 %v4246_v11  ;;  %3828 = vmatpush3.bf16.msra.mxu0 %v4248_v13  ;;  %v4327_v11 = vld [vmem:[%s5433_s1 + $0x448] sm:$0xff]  }
  0xb8   : > { %3765 = vmatprep.subr.bf16.mxu1 %v4255_v14  ;;  %3829 = vmatprep.subr.bf16.mxu0 %v4257_v17  ;;  %v4326_v12 = vld [vmem:[%s5433_s1 + $0x388] sm:$0xff]   ;;  %v4335_v14 = vld [vmem:[%s5433_s1 + $0x3d0] sm:$0xff]  }
  0xb9   : > { %v4328_v13 = vld [vmem:[%s5433_s1 + $0x408] sm:$0xff]   ;;  %v4337_v17 = vld [vmem:[%s5433_s1 + $0x450] sm:$0xff]  }
  0xba   : > { %2516 = vmatmul.mubr.bf16.gmra.mrb[52].mxu1 %v4243_v15  ;;  %2613 = vmatmul.mubr.bf16.gmra.mrb[52].mxu0 %v4244_v16  ;;  %v4323_v15 = vld [vmem:[%s4606_s24 + $0xb8] ss:$72 sps:$4 sm:$0xff]  }
  0xbb   : > { %2523 = vmatprep.mubr.bf16.mxu1 %v4249_v18  ;;  %2620 = vmatprep.mubr.bf16.mxu0 %v4251_v19  ;;  %v4324_v16 = vld [vmem:[%s4606_s24 + $0xc0] ss:$72 sps:$4 sm:$0xff]   ;;  %v4329_v18 = vld [vmem:[%s4606_s24 + $0x14c] ss:$72 sps:$4 sm:$0xff]  }
  0xbc   : > { %3766 = vmatpush3.bf16.msra.mxu1 %v4256_v20  ;;  %3830 = vmatpush3.bf16.msra.mxu0 %v4258_v21  ;;  %v4331_v19 = vld [vmem:[%s4606_s24 + $0x154] ss:$72 sps:$4 sm:$0xff]  }
  0xbd   : > { %3767 = vmatprep.subr.bf16.mxu1 %v4265_v22  ;;  %3831 = vmatprep.subr.bf16.mxu0 %v4267_v23  ;;  %v4336_v20 = vld [vmem:[%s5433_s1 + $0x390] sm:$0xff]   ;;  %v4345_v22 = vld [vmem:[%s5433_s1 + $0x3d8] sm:$0xff]  }
  0xbe   : > { %v4338_v21 = vld [vmem:[%s5433_s1 + $0x410] sm:$0xff]   ;;  %v4347_v23 = vld [vmem:[%s5433_s1 + $0x458] sm:$0xff]  }
  0xc0   : > { %3768 = vmatpush3.bf16.msra.mxu1 %v4266_v26  ;;  %3832 = vmatpush3.bf16.msra.mxu0 %v4268_v27  ;;  %v4333_v26 = vld [vmem:[%s4606_s24 + $0x148] ss:$72 sps:$4 sm:$0xff]  }
  0xc1   : > { %3769 = vmatprep.subr.bf16.mxu1 %v4275_v30  ;;  %3833 = vmatprep.subr.bf16.mxu0 %v4277_v32  ;;  %v4334_v27 = vld [vmem:[%s4606_s24 + $0x150] ss:$72 sps:$4 sm:$0xff]   ;;  %v4339_v30 = vld [vmem:[%s4606_s24 + $0x1dc] ss:$72 sps:$4 sm:$0xff]  }
  0xc2   : > { %2524 = vmatmul.mubr.bf16.gmra.mrb[56].mxu1 %v4253_v24  ;;  %2621 = vmatmul.mubr.bf16.gmra.mrb[56].mxu0 %v4254_v25  ;;  %v4346_v24 = vld [vmem:[%s5433_s1 + $0x398] sm:$0xff]   ;;  %v4356_v32 = vld [vmem:[%s5433_s1 + $0x3a0] sm:$0xff]  }
  0xc3   : > { %2531 = vmatprep.mubr.bf16.mxu1 %v4259_v28  ;;  %2628 = vmatprep.mubr.bf16.mxu0 %v4261_v29  ;;  %v4348_v25 = vld [vmem:[%s5433_s1 + $0x418] sm:$0xff]   ;;  %v4355_v28 = vld [vmem:[%s5433_s1 + $0x3e0] sm:$0xff]  }
  0xc4   : > { %3770 = vmatpush3.bf16.msra.mxu1 %v4276_v31  ;;  %3834 = vmatpush3.bf16.msra.mxu0 %v4278_v33  ;;  %v4357_v29 = vld [vmem:[%s5433_s1 + $0x460] sm:$0xff]  }
  0xc5   : > { %3771 = vmatprep.subr.bf16.mxu1 %v4285_v36  ;;  %3835 = vmatprep.subr.bf16.mxu0 %v4287_v40  ;;  %v4341_v31 = vld [vmem:[%s4606_s24 + $0x1e4] ss:$72 sps:$4 sm:$0xff]   ;;  %v4375_v40 = vld [vmem:[%s5433_s1 + $0x3f0] sm:$0xff]  }
  0xc6   : > { %v4358_v33 = vld [vmem:[%s5433_s1 + $0x420] sm:$0xff]   ;;  %v4366_v36 = vld [vmem:[%s5433_s1 + $0x3a8] sm:$0xff]  }
  0xc8   : > { %3772 = vmatpush3.bf16.msra.mxu1 %v4286_v39  ;;  %3836 = vmatpush3.bf16.msra.mxu0 %v4288_v41  ;;  %v4344_v39 = vld [vmem:[%s4606_s24 + $0x1e0] ss:$72 sps:$4 sm:$0xff]   ;;  %v4349_v41 = vld [vmem:[%s4606_s24 + $0x26c] ss:$72 sps:$4 sm:$0xff]  }
  0xc9   : > { %3773 = vmatprep.subr.bf16.mxu1 %v4295_v42  ;;  %3837 = vmatprep.subr.bf16.mxu0 %v4297_v47  ;;  %v4377_v42 = vld [vmem:[%s5433_s1 + $0x470] sm:$0xff]   ;;  %v4387_v47 = vld [vmem:[%s5433_s1 + $0x478] sm:$0xff]  }
  0xca   : > { %2532 = vmatmul.mubr.bf16.gmra.mrb[60].mxu1 %v4263_v34  ;;  %2629 = vmatmul.mubr.bf16.gmra.mrb[60].mxu0 %v4264_v35  ;;  %v4365_v34 = vld [vmem:[%s5433_s1 + $0x3e8] sm:$0xff]  }
  0xcb   : > { %2539 = vmatprep.mubr.bf16.mxu1 %v4269_v37  ;;  %2636 = vmatprep.mubr.bf16.mxu0 %v4271_v38  ;;  %v4367_v35 = vld [vmem:[%s5433_s1 + $0x468] sm:$0xff]   ;;  %v4343_v38 = vld [vmem:[%s4606_s24 + $0x1d8] ss:$72 sps:$4 sm:$0xff]  }
  0xcc   : > { %3774 = vmatpush3.bf16.msra.mxu1 %v4296_v45  ;;  %3838 = vmatpush3.bf16.msra.mxu0 %v4298_v48  ;;  %v4368_v37 = vld [vmem:[%s5433_s1 + $0x428] sm:$0xff]   ;;  %v4378_v45 = vld [vmem:[%s5433_s1 + $0x430] sm:$0xff]   ;;  %v4386_v48 = vld [vmem:[%s5433_s1 + $0x3b8] sm:$0xff]  }
  0xcd   : > { %3775 = vmatprep.subr.bf16.mxu1 %v4305_v50  ;;  %3839 = vmatprep.subr.bf16.mxu0 %v4307_v52  ;;  %v4353_v50 = vld [vmem:[%s4606_s24 + $0x268] ss:$72 sps:$4 sm:$0xff]   ;;  %v4359_v52 = vld [vmem:[%s4606_s24 + $0x2fc] ss:$72 sps:$4 sm:$0xff]  }
  0xd0   : > { %3776 = vmatpush3.bf16.msra.mxu1 %v4306_v51  ;;  %3840 = vmatpush3.bf16.msra.mxu0 %v4308_v53  ;;  %v4354_v51 = vld [vmem:[%s4606_s24 + $0x270] ss:$72 sps:$4 sm:$0xff]   ;;  %v4361_v53 = vld [vmem:[%s4606_s24 + $0x304] ss:$72 sps:$4 sm:$0xff]  }
  0xd1   : > { %3889 = vmatprep.subr.bf16.mxu1 %v4315_v58  ;;  %3953 = vmatprep.subr.bf16.mxu0 %v4317_v59  ;;  %v4373_v58 = vld [vmem:[%s4606_s24 + $0x388] ss:$72 sps:$4 sm:$0xff]  }
  0xd2   : > { %2540 = vmatmul.mubr.bf16.gmra.mrb[64].mxu1 %v4273_v43  ;;  %2637 = vmatmul.mubr.bf16.gmra.mrb[64].mxu0 %v4274_v44  ;;  %v4351_v43 = vld [vmem:[%s4606_s24 + $0x274] ss:$72 sps:$4 sm:$0xff]   ;;  %v4374_v59 = vld [vmem:[%s4606_s24 + $0x390] ss:$72 sps:$4 sm:$0xff]  }
  0xd3   : > { %2547 = vmatprep.mubr.bf16.mxu1 %v4279_v46  ;;  %2644 = vmatprep.mubr.bf16.mxu0 %v4281_v49  ;;  %v4376_v44 = vld [vmem:[%s5433_s1 + $0x3b0] sm:$0xff]   ;;  %v4385_v46 = vld [vmem:[%s5433_s1 + $0x3f8] sm:$0xff]  }
  0xd4   : > { %v4388_v49 = vld [vmem:[%s5433_s1 + $0x438] sm:$0xff]  }
  0xda   : > { %2548 = vmatmul.mubr.bf16.gmra.mrb[68].mxu1 %v4283_v54  ;;  %2645 = vmatmul.mubr.bf16.gmra.mrb[68].mxu0 %v4284_v55  ;;  %v4363_v54 = vld [vmem:[%s4606_s24 + $0x2f8] ss:$72 sps:$4 sm:$0xff]  }
  0xdb   : > { %2555 = vmatprep.mubr.bf16.mxu1 %v4289_v56  ;;  %2652 = vmatprep.mubr.bf16.mxu0 %v4291_v57  ;;  %v4364_v55 = vld [vmem:[%s4606_s24 + $0x300] ss:$72 sps:$4 sm:$0xff]   ;;  %v4369_v56 = vld [vmem:[%s4606_s24 + $0x38c] ss:$72 sps:$4 sm:$0xff]  }
  0xdc   : > { %v4371_v57 = vld [vmem:[%s4606_s24 + $0x394] ss:$72 sps:$4 sm:$0xff]  }
  0xe2   : > { %2556 = vmatmul.mubr.bf16.gmra.mrb[72].mxu1 %v4293_v60  ;;  %2653 = vmatmul.mubr.bf16.gmra.mrb[72].mxu0 %v4294_v61  ;;  %v4379_v60 = vld [vmem:[%s4606_s24 + $0x41c] ss:$72 sps:$4 sm:$0xff]  }
  0xe3   : > { %2563 = vmatprep.mubr.bf16.mxu1 %v4299_v62  ;;  %2660 = vmatprep.mubr.bf16.mxu0 %v4301_v63  ;;  %v4381_v61 = vld [vmem:[%s4606_s24 + $0x424] ss:$72 sps:$4 sm:$0xff]  }
  0xea   : > { %2564 = vmatmul.mubr.bf16.gmra.mrb[76].mxu1 %v4303_v0  ;;  %2661 = vmatmul.mubr.bf16.gmra.mrb[76].mxu0 %v4304_v1 }
  0xeb   : > { %2701 = vmatprep.mubr.bf16.mxu1 %v4311_v2  ;;  %2798 = vmatprep.mubr.bf16.mxu0 %v4314_v3  ;;  %v4383_v2 = vld [vmem:[%s4606_s24 + $0x418] ss:$72 sps:$4 sm:$0xff]  }
  0xec   : > { %v4384_v3 = vld [vmem:[%s4606_s24 + $0x420] ss:$72 sps:$4 sm:$0xff]  }
  0xf2   : > { %2702 = vmatmul.mubr.bf16.vlgmr.msra.gmra.mrb[80].mxu1 %v4309_v4  ;;  %2799 = vmatmul.mubr.bf16.vlgmr.msra.gmra.mrb[80].mxu0 %v4312_v5 }
  0xf3   : > { %3890 = vmatpush3.bf16.msra.mxu1 %v4316_v6  ;;  %3954 = vmatpush3.bf16.msra.mxu0 %v4318_v7 }
  0xf4   : > { %2709 = vmatprep.mubr.bf16.mxu1 %v4319_v8  ;;  %2806 = vmatprep.mubr.bf16.mxu0 %v4321_v9  ;;  %v4391_v8 = vld [vmem:[%s4606_s24 + $0x3c] ss:$72 sps:$4 sm:$0xff]  }
  0xf5   : > { %3891 = vmatprep.subr.bf16.mxu1 %v4325_v10  ;;  %3955 = vmatprep.subr.bf16.mxu0 %v4327_v11  ;;  %v4394_v9 = vld [vmem:[%s4606_s24 + $0x44] ss:$72 sps:$4 sm:$0xff]  }
  0xf7   : > { %3892 = vmatpush3.bf16.msra.mxu1 %v4326_v12  ;;  %3956 = vmatpush3.bf16.msra.mxu0 %v4328_v13 }
  0xf8   : > { %3893 = vmatprep.subr.bf16.mxu1 %v4335_v14  ;;  %3957 = vmatprep.subr.bf16.mxu0 %v4337_v17 }
  0xfa   : > { %2710 = vmatmul.mubr.bf16.gmra.mrb[84].mxu1 %v4323_v15  ;;  %2807 = vmatmul.mubr.bf16.gmra.mrb[84].mxu0 %v4324_v16 }
  0xfb   : > { %2717 = vmatprep.mubr.bf16.mxu1 %v4329_v18  ;;  %2814 = vmatprep.mubr.bf16.mxu0 %v4331_v19  ;;  %v4389_v18 = vld [vmem:[%s4606_s24 + $0x38] ss:$72 sps:$4 sm:$0xff]  }
  0xfc   : > { %3894 = vmatpush3.bf16.msra.mxu1 %v4336_v20  ;;  %3958 = vmatpush3.bf16.msra.mxu0 %v4338_v21  ;;  %v4392_v19 = vld [vmem:[%s4606_s24 + $0x40] ss:$72 sps:$4 sm:$0xff]  }
  0xfd   : > { %3895 = vmatprep.subr.bf16.mxu1 %v4345_v22  ;;  %3959 = vmatprep.subr.bf16.mxu0 %v4347_v23 }
 0x100   : > { %3896 = vmatpush3.bf16.msra.mxu1 %v4346_v24  ;;  %3960 = vmatpush3.bf16.msra.mxu0 %v4348_v25  ;;  %v4395_v24 = vld [vmem:[%s4606_s24 + $0xcc] ss:$72 sps:$4 sm:$0xff]  }
 0x101   : > { %3897 = vmatprep.subr.bf16.mxu1 %v4355_v28  ;;  %3961 = vmatprep.subr.bf16.mxu0 %v4357_v29  ;;  %v4397_v25 = vld [vmem:[%s4606_s24 + $0xd4] ss:$72 sps:$4 sm:$0xff]  }
 0x102   : > { %2718 = vmatmul.mubr.bf16.gmra.mrb[88].mxu1 %v4333_v26  ;;  %2815 = vmatmul.mubr.bf16.gmra.mrb[88].mxu0 %v4334_v27 }
 0x103   : > { %2725 = vmatprep.mubr.bf16.mxu1 %v4339_v30  ;;  %2822 = vmatprep.mubr.bf16.mxu0 %v4341_v31 }
 0x104   : > { %3898 = vmatpush3.bf16.msra.mxu1 %v4356_v32  ;;  %3962 = vmatpush3.bf16.msra.mxu0 %v4358_v33 }
 0x105   : > { %3899 = vmatprep.subr.bf16.mxu1 %v4365_v34  ;;  %3963 = vmatprep.subr.bf16.mxu0 %v4367_v35  ;;  %v4399_v34 = vld [vmem:[%s4606_s24 + $0xc8] ss:$72 sps:$4 sm:$0xff]  }
 0x106   : > { %v4400_v35 = vld [vmem:[%s4606_s24 + $0xd0] ss:$72 sps:$4 sm:$0xff]  }
 0x108   : > { %3900 = vmatpush3.bf16.msra.mxu1 %v4366_v36  ;;  %3964 = vmatpush3.bf16.msra.mxu0 %v4368_v37 }
 0x109   : > { %3901 = vmatprep.subr.bf16.mxu1 %v4375_v40  ;;  %3965 = vmatprep.subr.bf16.mxu0 %v4377_v42  ;;  %v4401_v40 = vld [vmem:[%s4606_s24 + $0x15c] ss:$72 sps:$4 sm:$0xff]  }
 0x10a   : > { %2726 = vmatmul.mubr.bf16.gmra.mrb[92].mxu1 %v4343_v38  ;;  %2823 = vmatmul.mubr.bf16.gmra.mrb[92].mxu0 %v4344_v39 }
 0x10b   : > { %2733 = vmatprep.mubr.bf16.mxu1 %v4349_v41  ;;  %2830 = vmatprep.mubr.bf16.mxu0 %v4351_v43  ;;  %v4403_v41 = vld [vmem:[%s4606_s24 + $0x164] ss:$72 sps:$4 sm:$0xff]  }
 0x10c   : > { %3902 = vmatpush3.bf16.msra.mxu1 %v4376_v44  ;;  %3966 = vmatpush3.bf16.msra.mxu0 %v4378_v45 }
 0x10d   : > { %3903 = vmatprep.subr.bf16.mxu1 %v4385_v46  ;;  %3967 = vmatprep.subr.bf16.mxu0 %v4387_v47 }
 0x110   : > { %3904 = vmatpush3.bf16.msra.mxu1 %v4386_v48  ;;  %3968 = vmatpush3.bf16.msra.mxu0 %v4388_v49 }
 0x112   : > { %2734 = vmatmul.mubr.bf16.gmra.mrb[96].mxu1 %v4353_v50  ;;  %2831 = vmatmul.mubr.bf16.gmra.mrb[96].mxu0 %v4354_v51  ;;  %v4405_v50 = vld [vmem:[%s4606_s24 + $0x158] ss:$72 sps:$4 sm:$0xff]  }
 0x113   : > { %2741 = vmatprep.mubr.bf16.mxu1 %v4359_v52  ;;  %2838 = vmatprep.mubr.bf16.mxu0 %v4361_v53  ;;  %v4406_v51 = vld [vmem:[%s4606_s24 + $0x160] ss:$72 sps:$4 sm:$0xff]  }
 0x11a   : > { %2742 = vmatmul.mubr.bf16.gmra.mrb[100].mxu1 %v4363_v54  ;;  %2839 = vmatmul.mubr.bf16.gmra.mrb[100].mxu0 %v4364_v55 }
 0x11b   : > { %2749 = vmatprep.mubr.bf16.mxu1 %v4369_v56  ;;  %2846 = vmatprep.mubr.bf16.mxu0 %v4371_v57  ;;  %v4407_v56 = vld [vmem:[%s4606_s24 + $0x1ec] ss:$72 sps:$4 sm:$0xff]  }
 0x11c   : > { %v4409_v57 = vld [vmem:[%s4606_s24 + $0x1f4] ss:$72 sps:$4 sm:$0xff]  }
 0x122   : > { %2750 = vmatmul.mubr.bf16.gmra.mrb[104].mxu1 %v4373_v58  ;;  %2847 = vmatmul.mubr.bf16.gmra.mrb[104].mxu0 %v4374_v59 }
 0x123   : > { %2757 = vmatprep.mubr.bf16.mxu1 %v4379_v60  ;;  %2854 = vmatprep.mubr.bf16.mxu0 %v4381_v61 }
 0x125   : > { %v3457_v62 = vpop.f32.mrb[0].mxu0  ;;  %v3481_v63 = vpop.f32.mrb[0].mxu1 }
 0x126   : > { %v3458_v0 = vpop.f32.mrb[1].mxu0  ;;  %v3482_v1 = vpop.f32.mrb[1].mxu1 }
 0x127   : > { %v5156_v4 = vadd.f32 %v3458_v0, %v3457_v62  ;;  %v5158_v5 = vadd.f32 %v3482_v1, %v3481_v63  ;;  %v3460_v6 = vpop.f32.mrb[2].mxu0  ;;  %v3484_v7 = vpop.f32.mrb[2].mxu1 }
 0x128   : > { %v3461_v10 = vpop.f32.mrb[3].mxu0  ;;  %v3485_v11 = vpop.f32.mrb[3].mxu1 }
 0x129   : > { %v5162_v12 = vadd.f32 %v3461_v10, %v3460_v6  ;;  %v5164_v13 = vadd.f32 %v3485_v11, %v3484_v7  ;;  %v4413_v10 = vld [vmem:[%s4606_s24 + $0x27c] ss:$72 sps:$4 sm:$0xff]  }
 0x12a   : > { %2758 = vmatmul.mubr.bf16.gmra.mrb[108].mxu1 %v4383_v2  ;;  %2855 = vmatmul.mubr.bf16.gmra.mrb[108].mxu0 %v4384_v3  ;;  %v4411_v2 = vld [vmem:[%s4606_s24 + $0x1e8] ss:$72 sps:$4 sm:$0xff]   ;;  %v4415_v11 = vld [vmem:[%s4606_s24 + $0x284] ss:$72 sps:$4 sm:$0xff]  }
 0x12b   : > { %2895 = vmatprep.mubr.bf16.mxu1 %v4391_v8  ;;  %2992 = vmatprep.mubr.bf16.mxu0 %v4394_v9  ;;  %v4412_v3 = vld [vmem:[%s4606_s24 + $0x1f0] ss:$72 sps:$4 sm:$0xff]  }
 0x12d   : > { %v3463_v14 = vpop.f32.mrb[4].mxu0  ;;  %v3487_v15 = vpop.f32.mrb[4].mxu1 }
 0x12e   : > { %v3464_v16 = vpop.f32.mrb[5].mxu0  ;;  %v3488_v17 = vpop.f32.mrb[5].mxu1 }
 0x12f   : > { %v5168_v20 = vadd.f32 %v3464_v16, %v3463_v14  ;;  %v5170_v21 = vadd.f32 %v3488_v17, %v3487_v15  ;;  %v3466_v22 = vpop.f32.mrb[6].mxu0  ;;  %v3490_v23 = vpop.f32.mrb[6].mxu1 }
 0x130   : > { %v3467_v26 = vpop.f32.mrb[7].mxu0  ;;  %v3491_v27 = vpop.f32.mrb[7].mxu1 }
 0x131   : > { %v5174_v28 = vadd.f32 %v3467_v26, %v3466_v22  ;;  %v5176_v29 = vadd.f32 %v3491_v27, %v3490_v23 }
 0x132   : > { %2896 = vmatmul.mubr.bf16.vlgmr.msra.gmra.mrb[112].mxu1 %v4389_v18  ;;  %2993 = vmatmul.mubr.bf16.vlgmr.msra.gmra.mrb[112].mxu0 %v4392_v19 }
 0x133   : > { %2903 = vmatprep.mubr.bf16.mxu1 %v4395_v24  ;;  %3000 = vmatprep.mubr.bf16.mxu0 %v4397_v25 }
 0x135   : > { %v3469_v30 = vpop.f32.mrb[8].mxu0  ;;  %v3493_v31 = vpop.f32.mrb[8].mxu1 }
 0x136   : > { %v3470_v32 = vpop.f32.mrb[9].mxu0  ;;  %v3494_v33 = vpop.f32.mrb[9].mxu1 }
 0x137   : > { %v5180_v36 = vadd.f32 %v3470_v32, %v3469_v30  ;;  %v5182_v37 = vadd.f32 %v3494_v33, %v3493_v31  ;;  %v3472_v38 = vpop.f32.mrb[10].mxu0  ;;  %v3496_v39 = vpop.f32.mrb[10].mxu1  ;;  %v4417_v30 = vld [vmem:[%s4606_s24 + $0x278] ss:$72 sps:$4 sm:$0xff]  }
 0x138   : > { %v3473_v42 = vpop.f32.mrb[11].mxu0  ;;  %v3497_v43 = vpop.f32.mrb[11].mxu1 }
 0x139   : > { %v5186_v44 = vadd.f32 %v3473_v42, %v3472_v38  ;;  %v5188_v45 = vadd.f32 %v3497_v43, %v3496_v39  ;;  %v4421_v38 = vld [vmem:[%s4606_s24 + $0x314] ss:$72 sps:$4 sm:$0xff]  }
 0x13a   : > { %2904 = vmatmul.mubr.bf16.gmra.mrb[116].mxu1 %v4399_v34  ;;  %3001 = vmatmul.mubr.bf16.gmra.mrb[116].mxu0 %v4400_v35  ;;  %v4419_v35 = vld [vmem:[%s4606_s24 + $0x30c] ss:$72 sps:$4 sm:$0xff]  }
 0x13b   : > { %2911 = vmatprep.mubr.bf16.mxu1 %v4401_v40  ;;  %3008 = vmatprep.mubr.bf16.mxu0 %v4403_v41 }
 0x13d   : > { %v3475_v46 = vpop.f32.mrb[12].mxu0  ;;  %v3499_v47 = vpop.f32.mrb[12].mxu1 }
 0x13e   : > { %v3476_v48 = vpop.f32.mrb[13].mxu0  ;;  %v3500_v49 = vpop.f32.mrb[13].mxu1 }
 0x13f   : > { %v5192_v52 = vadd.f32 %v3476_v48, %v3475_v46  ;;  %v5194_v53 = vadd.f32 %v3500_v49, %v3499_v47  ;;  %v3478_v54 = vpop.f32.mrb[14].mxu0  ;;  %v3502_v55 = vpop.f32.mrb[14].mxu1 }
 0x140   : > { %v3479_v58 = vpop.f32.mrb[15].mxu0  ;;  %v3503_v59 = vpop.f32.mrb[15].mxu1 }
 0x141   : > { %v5198_v60 = vadd.f32 %v3479_v58, %v3478_v54  ;;  %v5200_v61 = vadd.f32 %v3503_v59, %v3502_v55  ;;  %v4423_v54 = vld [vmem:[%s4606_s24 + $0x308] ss:$72 sps:$4 sm:$0xff]   ;;  %v4425_v59 = vld [vmem:[%s4606_s24 + $0x39c] ss:$72 sps:$4 sm:$0xff]  }
 0x142   : > { %2912 = vmatmul.mubr.bf16.gmra.mrb[120].mxu1 %v4405_v50  ;;  %3009 = vmatmul.mubr.bf16.gmra.mrb[120].mxu0 %v4406_v51 }
 0x143   : > { %2919 = vmatprep.mubr.bf16.mxu1 %v4407_v56  ;;  %3016 = vmatprep.mubr.bf16.mxu0 %v4409_v57 }
 0x145   : > { %v3521_v62 = vpop.f32.mrb[16].mxu1  ;;  %v3585_v63 = vpop.f32.mrb[16].mxu0 }
 0x146   : > { %v3522_v0 = vpop.f32.mrb[17].mxu1  ;;  %v3586_v1 = vpop.f32.mrb[17].mxu0 }
 0x147   : > { %v3523_v6 = vadd.f32 %v3522_v0, %v3521_v62  ;;  %v3587_v7 = vadd.f32 %v3586_v1, %v3585_v63  ;;  %v3524_v8 = vpop.f32.mrb[18].mxu1  ;;  %v3588_v9 = vpop.f32.mrb[18].mxu0  ;;  %v4427_v62 = vld [vmem:[%s4606_s24 + $0x3a4] ss:$72 sps:$4 sm:$0xff]  }
 0x148   : > { %v3525_v14 = vpop.f32.mrb[19].mxu1  ;;  %v3589_v15 = vpop.f32.mrb[19].mxu0 }
 0x149   : > { %v2316_v16 = vadd.f32 %v3523_v6, %v5156_v4  ;;  %v3526_v17 = vadd.f32 %v3525_v14, %v3524_v8  ;;  %v3590_v18 = vadd.f32 %v3589_v15, %v3588_v9  ;;  %v4418_v4 = vld [vmem:[%s4606_s24 + $0x280] ss:$72 sps:$4 sm:$0xff]  }
 0x14a   : > { %2920 = vmatmul.mubr.bf16.gmra.mrb[124].mxu1 %v4411_v2  ;;  %3017 = vmatmul.mubr.bf16.gmra.mrb[124].mxu0 %v4412_v3  ;;  %v4429_v14 = vld [vmem:[%s4606_s24 + $0x398] ss:$72 sps:$4 sm:$0xff]  }
 0x14b   : > { %v5207_v19 = vadd.f32 %v3587_v7, %v2316_v16  ;;  %v2319_v22 = vadd.f32 %v3526_v17, %v5162_v12  ;;  %2927 = vmatprep.mubr.bf16.mxu1 %v4413_v10  ;;  %3024 = vmatprep.mubr.bf16.mxu0 %v4415_v11 }
 0x14d   : > { %v5210_v23 = vadd.f32 %v3590_v18, %v2319_v22  ;;  %v3527_v24 = vpop.f32.mrb[20].mxu1  ;;  %v3591_v25 = vpop.f32.mrb[20].mxu0  ;;  %v4431_v22 = vld [vmem:[%s4606_s24 + $0x42c] ss:$72 sps:$4 sm:$0xff]  }
 0x14e   : > { %v3528_v26 = vpop.f32.mrb[21].mxu1  ;;  %v3592_v27 = vpop.f32.mrb[21].mxu0 }
 0x14f   : > { %v3529_v31 = vadd.f32 %v3528_v26, %v3527_v24  ;;  %v3593_v32 = vadd.f32 %v3592_v27, %v3591_v25  ;;  %v3530_v33 = vpop.f32.mrb[22].mxu1  ;;  %v3594_v34 = vpop.f32.mrb[22].mxu0  ;;  %v4433_v24 = vld [vmem:[%s4606_s24 + $0x434] ss:$72 sps:$4 sm:$0xff]  }
 0x150   : > { %v3531_v39 = vpop.f32.mrb[23].mxu1  ;;  %v3595_v40 = vpop.f32.mrb[23].mxu0 }
 0x151   : > { %v2324_v12 = vadd.f32 %v3529_v31, %v5168_v20  ;;  %v3532_v41 = vadd.f32 %v3531_v39, %v3530_v33  ;;  %v3596_v42 = vadd.f32 %v3595_v40, %v3594_v34  ;;  %v4424_v20 = vld [vmem:[%s4606_s24 + $0x310] ss:$72 sps:$4 sm:$0xff]  }
 0x152   : > { %2928 = vmatmul.mubr.bf16.gmra.mrb[128].mxu1 %v4417_v30  ;;  %3025 = vmatmul.mubr.bf16.gmra.mrb[128].mxu0 %v4418_v4  ;;  %v4435_v39 = vld [vmem:[%s4606_s24 + $0x428] ss:$72 sps:$4 sm:$0xff]  }
 0x153   : > { %v5217_v43 = vadd.f32 %v3593_v32, %v2324_v12  ;;  %v2327_v46 = vadd.f32 %v3532_v41, %v5174_v28  ;;  %2935 = vmatprep.mubr.bf16.mxu1 %v4419_v35  ;;  %3032 = vmatprep.mubr.bf16.mxu0 %v4421_v38  ;;  %v4436_v40 = vld [vmem:[%s4606_s24 + $0x430] ss:$72 sps:$4 sm:$0xff]  }
 0x155   : > { %v5220_v47 = vadd.f32 %v3596_v42, %v2327_v46  ;;  %v3533_v48 = vpop.f32.mrb[24].mxu1  ;;  %v3597_v49 = vpop.f32.mrb[24].mxu0 }
 0x156   : > { %v3534_v50 = vpop.f32.mrb[25].mxu1  ;;  %v3598_v51 = vpop.f32.mrb[25].mxu0 }
 0x157   : > { %v3535_v55 = vadd.f32 %v3534_v50, %v3533_v48  ;;  %v3599_v56 = vadd.f32 %v3598_v51, %v3597_v49  ;;  %v3536_v57 = vpop.f32.mrb[26].mxu1  ;;  %v3600_v58 = vpop.f32.mrb[26].mxu0 }
 0x158   : > { %v3537_v63 = vpop.f32.mrb[27].mxu1  ;;  %v3601_v0 = vpop.f32.mrb[27].mxu0 }
 0x159   : > { %v2332_v28 = vadd.f32 %v3535_v55, %v5180_v36  ;;  %v3538_v1 = vadd.f32 %v3537_v63, %v3536_v57  ;;  %v3602_v2 = vadd.f32 %v3601_v0, %v3600_v58  ;;  %v4430_v36 = vld [vmem:[%s4606_s24 + $0x3a0] ss:$72 sps:$4 sm:$0xff]   ;;  %s3149_s24 = sshll.u32 %s3141_s13, 4 }
 0x15a   : > { %2936 = vmatmul.mubr.bf16.gmra.mrb[132].mxu1 %v4423_v54  ;;  %3033 = vmatmul.mubr.bf16.gmra.mrb[132].mxu0 %v4424_v20  ;;  %p162_p7 = scmp.lt.s32.totalorder %s3149_s24, 47 }
 0x15b   : > { %v5227_v3 = vadd.f32 %v3599_v56, %v2332_v28  ;;  %v2335_v6 = vadd.f32 %v3538_v1, %v5186_v44  ;;  %2943 = vmatprep.mubr.bf16.mxu1 %v4425_v59  ;;  %3040 = vmatprep.mubr.bf16.mxu0 %v4427_v62 }
 0x15c   : > { %s5443_s24 = smov (!%p162_p7, %s3149_s24), 47 }
 0x15d   : > { %v5230_v7 = vadd.f32 %v3602_v2, %v2335_v6  ;;  %v3539_v8 = vpop.f32.mrb[28].mxu1  ;;  %v3603_v9 = vpop.f32.mrb[28].mxu0  ;;  %s3150_s12 = sshll.u32 %s5443_s24, 3 }
 0x15e   : > { %v3540_v10 = vpop.f32.mrb[29].mxu1  ;;  %v3604_v11 = vpop.f32.mrb[29].mxu0  ;;  %s5370_s16 = scalar_lea.vmem %s5434_s2, %s3150_s12 }
 0x15f   : > { %v3541_v15 = vadd.f32 %v3540_v10, %v3539_v8  ;;  %v3605_v16 = vadd.f32 %v3604_v11, %v3603_v9  ;;  %v3542_v17 = vpop.f32.mrb[30].mxu1  ;;  %v3606_v18 = vpop.f32.mrb[30].mxu0 }
 0x160   : > { %v3543_v25 = vpop.f32.mrb[31].mxu1  ;;  %v3607_v26 = vpop.f32.mrb[31].mxu0 }
 0x161   : > { %v2340_v44 = vadd.f32 %v3541_v15, %v5192_v52  ;;  %v3544_v27 = vadd.f32 %v3543_v25, %v3542_v17  ;;  %v3608_v30 = vadd.f32 %v3607_v26, %v3606_v18 }
 0x162   : > { %2944 = vmatmul.mubr.bf16.gmra.mrb[136].mxu1 %v4429_v14  ;;  %3041 = vmatmul.mubr.bf16.gmra.mrb[136].mxu0 %v4430_v36 }
 0x163   : > { %v5237_v4 = vadd.f32 %v3605_v16, %v2340_v44  ;;  %v2343_v31 = vadd.f32 %v3544_v27, %v5198_v60  ;;  %2951 = vmatprep.mubr.bf16.mxu1 %v4431_v22  ;;  %3048 = vmatprep.mubr.bf16.mxu0 %v4433_v24 }
 0x165   : > { %v5240_v32 = vadd.f32 %v3608_v30, %v2343_v31  ;;  %v3545_v33 = vpop.f32.mrb[32].mxu1  ;;  %v3609_v34 = vpop.f32.mrb[32].mxu0 }
 0x166   : > { %v3546_v35 = vpop.f32.mrb[33].mxu1  ;;  %v3610_v38 = vpop.f32.mrb[33].mxu0 }
 0x167   : > { %v3547_v12 = vadd.f32 %v3546_v35, %v3545_v33  ;;  %v3611_v52 = vadd.f32 %v3610_v38, %v3609_v34  ;;  %v3548_v41 = vpop.f32.mrb[34].mxu1  ;;  %v3612_v42 = vpop.f32.mrb[34].mxu0 }
 0x168   : > { %v3549_v46 = vpop.f32.mrb[35].mxu1  ;;  %v3613_v48 = vpop.f32.mrb[35].mxu0 }
 0x169   : > { %v2348_v49 = vadd.f32 %v3547_v12, %v5158_v5  ;;  %v3550_v50 = vadd.f32 %v3549_v46, %v3548_v41  ;;  %v3614_v60 = vadd.f32 %v3613_v48, %v3612_v42 }
 0x16a   : > { %2952 = vmatmul.mubr.bf16.gmra.mrb[140].mxu1 %v4435_v39  ;;  %3049 = vmatmul.mubr.bf16.gmra.mrb[140].mxu0 %v4436_v40 }
 0x16b   : > { %v5245_v51 = vadd.f32 %v3611_v52, %v2348_v49  ;;  %v2351_v54 = vadd.f32 %v3550_v50, %v5164_v13 }
 0x16d   : > { %v5248_v20 = vadd.f32 %v3614_v60, %v2351_v54  ;;  %v3551_v55 = vpop.f32.mrb[36].mxu1  ;;  %v3615_v56 = vpop.f32.mrb[36].mxu0 }
 0x16e   : > { %v3552_v57 = vpop.f32.mrb[37].mxu1  ;;  %v3616_v58 = vpop.f32.mrb[37].mxu0 }
 0x16f   : > { %v3553_v59 = vadd.f32 %v3552_v57, %v3551_v55  ;;  %v3617_v62 = vadd.f32 %v3616_v58, %v3615_v56  ;;  %v3554_v63 = vpop.f32.mrb[38].mxu1  ;;  %v3618_v0 = vpop.f32.mrb[38].mxu0 }
 0x170   : > { %v3555_v28 = vpop.f32.mrb[39].mxu1  ;;  %v3619_v5 = vpop.f32.mrb[39].mxu0 }
 0x171   : > { %v2356_v1 = vadd.f32 %v3553_v59, %v5170_v21  ;;  %v3556_v2 = vadd.f32 %v3555_v28, %v3554_v63  ;;  %v3620_v6 = vadd.f32 %v3619_v5, %v3618_v0 }
 0x173   : > { %v5251_v8 = vadd.f32 %v3617_v62, %v2356_v1  ;;  %v2359_v13 = vadd.f32 %v3556_v2, %v5176_v29 }
 0x175   : > { %v5254_v9 = vadd.f32 %v3620_v6, %v2359_v13  ;;  %v3557_v10 = vpop.f32.mrb[40].mxu1  ;;  %v3621_v11 = vpop.f32.mrb[40].mxu0 }
 0x176   : > { %v3558_v14 = vpop.f32.mrb[41].mxu1  ;;  %v3622_v36 = vpop.f32.mrb[41].mxu0 }
 0x177   : > { %v3559_v15 = vadd.f32 %v3558_v14, %v3557_v10  ;;  %v3623_v16 = vadd.f32 %v3622_v36, %v3621_v11  ;;  %v3560_v17 = vpop.f32.mrb[42].mxu1  ;;  %v3624_v18 = vpop.f32.mrb[42].mxu0 }
 0x178   : > { %v3561_v22 = vpop.f32.mrb[43].mxu1  ;;  %v3625_v24 = vpop.f32.mrb[43].mxu0 }
 0x179   : > { %v2364_v21 = vadd.f32 %v3559_v15, %v5182_v37  ;;  %v3562_v25 = vadd.f32 %v3561_v22, %v3560_v17  ;;  %v3626_v26 = vadd.f32 %v3625_v24, %v3624_v18 }
 0x17b   : > { %v5257_v44 = vadd.f32 %v3623_v16, %v2364_v21  ;;  %v2367_v29 = vadd.f32 %v3562_v25, %v5188_v45 }
 0x17d   : > { %v5260_v27 = vadd.f32 %v3626_v26, %v2367_v29  ;;  %v3563_v30 = vpop.f32.mrb[44].mxu1  ;;  %v3627_v31 = vpop.f32.mrb[44].mxu0 }
 0x17e   : > { %v3564_v33 = vpop.f32.mrb[45].mxu1  ;;  %v3628_v34 = vpop.f32.mrb[45].mxu0 }
 0x17f   : > { %v3565_v35 = vadd.f32 %v3564_v33, %v3563_v30  ;;  %v3629_v38 = vadd.f32 %v3628_v34, %v3627_v31  ;;  %v3566_v39 = vpop.f32.mrb[46].mxu1  ;;  %v3630_v40 = vpop.f32.mrb[46].mxu0 }
 0x180   : > { %v3567_v12 = vpop.f32.mrb[47].mxu1  ;;  %v3631_v52 = vpop.f32.mrb[47].mxu0 }
 0x181   : > { %v2372_v37 = vadd.f32 %v3565_v35, %v5194_v53  ;;  %v3568_v41 = vadd.f32 %v3567_v12, %v3566_v39  ;;  %v3632_v42 = vadd.f32 %v3631_v52, %v3630_v40 }
 0x183   : > { %v5263_v46 = vadd.f32 %v3629_v38, %v2372_v37  ;;  %v2375_v45 = vadd.f32 %v3568_v41, %v5200_v61 }
 0x185   : > { %v5266_v48 = vadd.f32 %v3632_v42, %v2375_v45  ;;  %v3649_v49 = vpop.f32.mrb[48].mxu1  ;;  %v3713_v50 = vpop.f32.mrb[48].mxu0 }
 0x186   : > { %v3650_v60 = vpop.f32.mrb[49].mxu1  ;;  %v3714_v54 = vpop.f32.mrb[49].mxu0 }
 0x187   : > { %v3651_v55 = vadd.f32 %v3650_v60, %v3649_v49  ;;  %v3715_v56 = vadd.f32 %v3714_v54, %v3713_v50  ;;  %v3652_v57 = vpop.f32.mrb[50].mxu1  ;;  %v3716_v58 = vpop.f32.mrb[50].mxu0 }
 0x188   : > { %v3653_v59 = vpop.f32.mrb[51].mxu1  ;;  %v3717_v62 = vpop.f32.mrb[51].mxu0 }
 0x189   : > { %v2510_v53 = vadd.f32 %v3651_v55, %v5207_v19  ;;  %v3654_v63 = vadd.f32 %v3653_v59, %v3652_v57  ;;  %v3718_v0 = vadd.f32 %v3717_v62, %v3716_v58 }
 0x18b   : > { %v5269_v28 = vadd.f32 %v3715_v56, %v2510_v53  ;;  %v2513_v61 = vadd.f32 %v3654_v63, %v5210_v23 }
 0x18d   : > { %v5272_v5 = vadd.f32 %v3718_v0, %v2513_v61  ;;  %v3655_v1 = vpop.f32.mrb[52].mxu1  ;;  %v3719_v2 = vpop.f32.mrb[52].mxu0 }
 0x18e   : > { %v3656_v6 = vpop.f32.mrb[53].mxu1  ;;  %v3720_v13 = vpop.f32.mrb[53].mxu0 }
 0x18f   : > { %v3657_v10 = vadd.f32 %v3656_v6, %v3655_v1  ;;  %v3721_v11 = vadd.f32 %v3720_v13, %v3719_v2  ;;  %v3658_v14 = vpop.f32.mrb[54].mxu1  ;;  %v3722_v36 = vpop.f32.mrb[54].mxu0 }
 0x190   : > { %v3659_v15 = vpop.f32.mrb[55].mxu1  ;;  %v3723_v16 = vpop.f32.mrb[55].mxu0 }
 0x191   : > { %v2518_v19 = vadd.f32 %v3657_v10, %v5217_v43  ;;  %v3660_v17 = vadd.f32 %v3659_v15, %v3658_v14  ;;  %v3724_v18 = vadd.f32 %v3723_v16, %v3722_v36 }
 0x193   : > { %v5275_v22 = vadd.f32 %v3721_v11, %v2518_v19  ;;  %v2521_v23 = vadd.f32 %v3660_v17, %v5220_v47 }
 0x195   : > { %v5278_v24 = vadd.f32 %v3724_v18, %v2521_v23  ;;  %v3661_v21 = vpop.f32.mrb[56].mxu1  ;;  %v3725_v25 = vpop.f32.mrb[56].mxu0 }
 0x196   : > { %v3662_v26 = vpop.f32.mrb[57].mxu1  ;;  %v3726_v29 = vpop.f32.mrb[57].mxu0 }
 0x197   : > { %v3663_v30 = vadd.f32 %v3662_v26, %v3661_v21  ;;  %v3727_v31 = vadd.f32 %v3726_v29, %v3725_v25  ;;  %v3664_v33 = vpop.f32.mrb[58].mxu1  ;;  %v3728_v34 = vpop.f32.mrb[58].mxu0 }
 0x198   : > { %v3665_v35 = vpop.f32.mrb[59].mxu1  ;;  %v3729_v38 = vpop.f32.mrb[59].mxu0 }
 0x199   : > { %v2526_v43 = vadd.f32 %v3663_v30, %v5227_v3  ;;  %v3666_v39 = vadd.f32 %v3665_v35, %v3664_v33  ;;  %v3730_v40 = vadd.f32 %v3729_v38, %v3728_v34 }
 0x19b   : > { %v5281_v12 = vadd.f32 %v3727_v31, %v2526_v43  ;;  %v2529_v47 = vadd.f32 %v3666_v39, %v5230_v7 }
 0x19d   : > { %v5284_v52 = vadd.f32 %v3730_v40, %v2529_v47  ;;  %v3667_v37 = vpop.f32.mrb[60].mxu1  ;;  %v3731_v41 = vpop.f32.mrb[60].mxu0 }
 0x19e   : > { %v3668_v42 = vpop.f32.mrb[61].mxu1  ;;  %v3732_v45 = vpop.f32.mrb[61].mxu0 }
 0x19f   : > { %v3669_v49 = vadd.f32 %v3668_v42, %v3667_v37  ;;  %v3733_v50 = vadd.f32 %v3732_v45, %v3731_v41  ;;  %v3670_v60 = vpop.f32.mrb[62].mxu1  ;;  %v3734_v54 = vpop.f32.mrb[62].mxu0 }
 0x1a0   : > { %v3671_v55 = vpop.f32.mrb[63].mxu1  ;;  %v3735_v56 = vpop.f32.mrb[63].mxu0 }
 0x1a1   : > { %v2534_v3 = vadd.f32 %v3669_v49, %v5237_v4  ;;  %v3672_v57 = vadd.f32 %v3671_v55, %v3670_v60  ;;  %v3736_v58 = vadd.f32 %v3735_v56, %v3734_v54 }
 0x1a3   : > { %v5287_v59 = vadd.f32 %v3733_v50, %v2534_v3  ;;  %v2537_v7 = vadd.f32 %v3672_v57, %v5240_v32 }
 0x1a5   : > { %v5290_v62 = vadd.f32 %v3736_v58, %v2537_v7  ;;  %v3673_v53 = vpop.f32.mrb[64].mxu1  ;;  %v3737_v63 = vpop.f32.mrb[64].mxu0 }
 0x1a6   : > { %v3674_v0 = vpop.f32.mrb[65].mxu1  ;;  %v3738_v61 = vpop.f32.mrb[65].mxu0 }
 0x1a7   : > { %v3675_v1 = vadd.f32 %v3674_v0, %v3673_v53  ;;  %v3739_v2 = vadd.f32 %v3738_v61, %v3737_v63  ;;  %v3676_v6 = vpop.f32.mrb[66].mxu1  ;;  %v3740_v13 = vpop.f32.mrb[66].mxu0 }
 0x1a8   : > { %v3677_v10 = vpop.f32.mrb[67].mxu1  ;;  %v3741_v11 = vpop.f32.mrb[67].mxu0 }
 0x1a9   : > { %v2542_v4 = vadd.f32 %v3675_v1, %v5245_v51  ;;  %v3678_v14 = vadd.f32 %v3677_v10, %v3676_v6  ;;  %v3742_v36 = vadd.f32 %v3741_v11, %v3740_v13 }
 0x1ab   : > { %v5293_v15 = vadd.f32 %v3739_v2, %v2542_v4  ;;  %v2545_v32 = vadd.f32 %v3678_v14, %v5248_v20 }
 0x1ad   : > { %v5296_v16 = vadd.f32 %v3742_v36, %v2545_v32  ;;  %v3679_v19 = vpop.f32.mrb[68].mxu1  ;;  %v3743_v17 = vpop.f32.mrb[68].mxu0 }
 0x1ae   : > { %v3680_v18 = vpop.f32.mrb[69].mxu1  ;;  %v3744_v23 = vpop.f32.mrb[69].mxu0 }
 0x1af   : > { %v3681_v21 = vadd.f32 %v3680_v18, %v3679_v19  ;;  %v3745_v25 = vadd.f32 %v3744_v23, %v3743_v17  ;;  %v3682_v26 = vpop.f32.mrb[70].mxu1  ;;  %v3746_v29 = vpop.f32.mrb[70].mxu0 }
 0x1b0   : > { %v3683_v30 = vpop.f32.mrb[71].mxu1  ;;  %v3747_v31 = vpop.f32.mrb[71].mxu0 }
 0x1b1   : > { %v2550_v51 = vadd.f32 %v3681_v21, %v5251_v8  ;;  %v3684_v33 = vadd.f32 %v3683_v30, %v3682_v26  ;;  %v3748_v34 = vadd.f32 %v3747_v31, %v3746_v29 }
 0x1b3   : > { %v5299_v35 = vadd.f32 %v3745_v25, %v2550_v51  ;;  %v2553_v20 = vadd.f32 %v3684_v33, %v5254_v9 }
 0x1b5   : > { %v5302_v38 = vadd.f32 %v3748_v34, %v2553_v20  ;;  %v3685_v43 = vpop.f32.mrb[72].mxu1  ;;  %v3749_v39 = vpop.f32.mrb[72].mxu0 }
 0x1b6   : > { %v3686_v40 = vpop.f32.mrb[73].mxu1  ;;  %v3750_v47 = vpop.f32.mrb[73].mxu0 }
 0x1b7   : > { %v3687_v37 = vadd.f32 %v3686_v40, %v3685_v43  ;;  %v3751_v41 = vadd.f32 %v3750_v47, %v3749_v39  ;;  %v3688_v42 = vpop.f32.mrb[74].mxu1  ;;  %v3752_v45 = vpop.f32.mrb[74].mxu0 }
 0x1b8   : > { %v3689_v49 = vpop.f32.mrb[75].mxu1  ;;  %v3753_v50 = vpop.f32.mrb[75].mxu0 }
 0x1b9   : > { %v2558_v8 = vadd.f32 %v3687_v37, %v5257_v44  ;;  %v3690_v60 = vadd.f32 %v3689_v49, %v3688_v42  ;;  %v3754_v54 = vadd.f32 %v3753_v50, %v3752_v45 }
 0x1bb   : > { %v5305_v55 = vadd.f32 %v3751_v41, %v2558_v8  ;;  %v2561_v9 = vadd.f32 %v3690_v60, %v5260_v27 }
 0x1bd   : > { %v5308_v56 = vadd.f32 %v3754_v54, %v2561_v9  ;;  %v3691_v3 = vpop.f32.mrb[76].mxu1  ;;  %v3755_v57 = vpop.f32.mrb[76].mxu0 }
 0x1be   : > { %v3692_v58 = vpop.f32.mrb[77].mxu1  ;;  %v3756_v7 = vpop.f32.mrb[77].mxu0 }
 0x1bf   : > { %v3693_v53 = vadd.f32 %v3692_v58, %v3691_v3  ;;  %v3757_v63 = vadd.f32 %v3756_v7, %v3755_v57  ;;  %v3694_v0 = vpop.f32.mrb[78].mxu1  ;;  %v3758_v61 = vpop.f32.mrb[78].mxu0 }
 0x1c0   : > { %v3695_v1 = vpop.f32.mrb[79].mxu1  ;;  %v3759_v2 = vpop.f32.mrb[79].mxu0 }
 0x1c1   : > { %v2566_v44 = vadd.f32 %v3693_v53, %v5263_v46  ;;  %v3696_v6 = vadd.f32 %v3695_v1, %v3694_v0  ;;  %v3760_v13 = vadd.f32 %v3759_v2, %v3758_v61 }
 0x1c3   : > { %v5311_v10 = vadd.f32 %v3757_v63, %v2566_v44  ;;  %v2569_v27 = vadd.f32 %v3696_v6, %v5266_v48 }
 0x1c5   : > { %v5314_v11 = vadd.f32 %v3760_v13, %v2569_v27  ;;  %v3777_v4 = vpop.f32.mrb[80].mxu1  ;;  %v3841_v14 = vpop.f32.mrb[80].mxu0 }
 0x1c6   : > { %v3778_v36 = vpop.f32.mrb[81].mxu1  ;;  %v3842_v32 = vpop.f32.mrb[81].mxu0 }
 0x1c7   : > { %v3779_v19 = vadd.f32 %v3778_v36, %v3777_v4  ;;  %v3843_v17 = vadd.f32 %v3842_v32, %v3841_v14  ;;  %v3780_v18 = vpop.f32.mrb[82].mxu1  ;;  %v3844_v23 = vpop.f32.mrb[82].mxu0 }
 0x1c8   : > { %v3781_v21 = vpop.f32.mrb[83].mxu1  ;;  %v3845_v25 = vpop.f32.mrb[83].mxu0 }
 0x1c9   : > { %v2704_v46 = vadd.f32 %v3779_v19, %v5269_v28  ;;  %v3782_v26 = vadd.f32 %v3781_v21, %v3780_v18  ;;  %v3846_v29 = vadd.f32 %v3845_v25, %v3844_v23 }
 0x1cb   : > { %v5317_v30 = vadd.f32 %v3843_v17, %v2704_v46  ;;  %v2707_v48 = vadd.f32 %v3782_v26, %v5272_v5 }
 0x1cd   : > { %v5320_v31 = vadd.f32 %v3846_v29, %v2707_v48  ;;  %v3783_v51 = vpop.f32.mrb[84].mxu1  ;;  %v3847_v33 = vpop.f32.mrb[84].mxu0 }
 0x1ce   : > { %v3784_v34 = vpop.f32.mrb[85].mxu1  ;;  %v3848_v20 = vpop.f32.mrb[85].mxu0 }
 0x1cf   : > { %v3785_v43 = vadd.f32 %v3784_v34, %v3783_v51  ;;  %v3849_v39 = vadd.f32 %v3848_v20, %v3847_v33  ;;  %v3786_v40 = vpop.f32.mrb[86].mxu1  ;;  %v3850_v47 = vpop.f32.mrb[86].mxu0 }
 0x1d0   : > { %v3787_v37 = vpop.f32.mrb[87].mxu1  ;;  %v3851_v41 = vpop.f32.mrb[87].mxu0 }
 0x1d1   : > { %v2712_v28 = vadd.f32 %v3785_v43, %v5275_v22  ;;  %v3788_v42 = vadd.f32 %v3787_v37, %v3786_v40  ;;  %v3852_v45 = vadd.f32 %v3851_v41, %v3850_v47 }
 0x1d3   : > { %v5323_v49 = vadd.f32 %v3849_v39, %v2712_v28  ;;  %v2715_v5 = vadd.f32 %v3788_v42, %v5278_v24 }
 0x1d5   : > { %v5326_v50 = vadd.f32 %v3852_v45, %v2715_v5  ;;  %v3789_v8 = vpop.f32.mrb[88].mxu1  ;;  %v3853_v60 = vpop.f32.mrb[88].mxu0 }
 0x1d6   : > { %v3790_v54 = vpop.f32.mrb[89].mxu1  ;;  %v3854_v9 = vpop.f32.mrb[89].mxu0 }
 0x1d7   : > { %v3791_v3 = vadd.f32 %v3790_v54, %v3789_v8  ;;  %v3855_v57 = vadd.f32 %v3854_v9, %v3853_v60  ;;  %v3792_v58 = vpop.f32.mrb[90].mxu1  ;;  %v3856_v7 = vpop.f32.mrb[90].mxu0 }
 0x1d8   : > { %v3793_v53 = vpop.f32.mrb[91].mxu1  ;;  %v3857_v63 = vpop.f32.mrb[91].mxu0 }
 0x1d9   : > { %v2720_v22 = vadd.f32 %v3791_v3, %v5281_v12  ;;  %v3794_v0 = vadd.f32 %v3793_v53, %v3792_v58  ;;  %v3858_v61 = vadd.f32 %v3857_v63, %v3856_v7 }
 0x1db   : > { %v5329_v1 = vadd.f32 %v3855_v57, %v2720_v22  ;;  %v2723_v24 = vadd.f32 %v3794_v0, %v5284_v52 }
 0x1dd   : > { %v5332_v2 = vadd.f32 %v3858_v61, %v2723_v24  ;;  %v3795_v44 = vpop.f32.mrb[92].mxu1  ;;  %v3859_v6 = vpop.f32.mrb[92].mxu0 }
 0x1de   : > { %v3796_v13 = vpop.f32.mrb[93].mxu1  ;;  %v3860_v27 = vpop.f32.mrb[93].mxu0 }
 0x1df   : > { %v3797_v4 = vadd.f32 %v3796_v13, %v3795_v44  ;;  %v3861_v14 = vadd.f32 %v3860_v27, %v3859_v6  ;;  %v3798_v36 = vpop.f32.mrb[94].mxu1  ;;  %v3862_v32 = vpop.f32.mrb[94].mxu0 }
 0x1e0   : > { %v3799_v19 = vpop.f32.mrb[95].mxu1  ;;  %v3863_v17 = vpop.f32.mrb[95].mxu0 }
 0x1e1   : > { %v2728_v12 = vadd.f32 %v3797_v4, %v5287_v59  ;;  %v3800_v18 = vadd.f32 %v3799_v19, %v3798_v36  ;;  %v3864_v23 = vadd.f32 %v3863_v17, %v3862_v32 }
 0x1e3   : > { %v5335_v21 = vadd.f32 %v3861_v14, %v2728_v12  ;;  %v2731_v52 = vadd.f32 %v3800_v18, %v5290_v62 }
 0x1e5   : > { %v5338_v25 = vadd.f32 %v3864_v23, %v2731_v52  ;;  %v3801_v46 = vpop.f32.mrb[96].mxu1  ;;  %v3865_v26 = vpop.f32.mrb[96].mxu0 }
 0x1e6   : > { %v3802_v29 = vpop.f32.mrb[97].mxu1  ;;  %v3866_v48 = vpop.f32.mrb[97].mxu0 }
 0x1e7   : > { %v3803_v51 = vadd.f32 %v3802_v29, %v3801_v46  ;;  %v3867_v33 = vadd.f32 %v3866_v48, %v3865_v26  ;;  %v3804_v34 = vpop.f32.mrb[98].mxu1  ;;  %v3868_v20 = vpop.f32.mrb[98].mxu0 }
 0x1e8   : > { %v3805_v43 = vpop.f32.mrb[99].mxu1  ;;  %v3869_v39 = vpop.f32.mrb[99].mxu0 }
 0x1e9   : > { %v2736_v59 = vadd.f32 %v3803_v51, %v5293_v15  ;;  %v3806_v40 = vadd.f32 %v3805_v43, %v3804_v34  ;;  %v3870_v47 = vadd.f32 %v3869_v39, %v3868_v20 }
 0x1eb   : > { %v5341_v37 = vadd.f32 %v3867_v33, %v2736_v59  ;;  %v2739_v62 = vadd.f32 %v3806_v40, %v5296_v16 }
 0x1ed   : > { %v5344_v41 = vadd.f32 %v3870_v47, %v2739_v62  ;;  %v3807_v28 = vpop.f32.mrb[100].mxu1  ;;  %v3871_v42 = vpop.f32.mrb[100].mxu0 }
 0x1ee   : > { %v3808_v45 = vpop.f32.mrb[101].mxu1  ;;  %v3872_v5 = vpop.f32.mrb[101].mxu0 }
 0x1ef   : > { %v3809_v8 = vadd.f32 %v3808_v45, %v3807_v28  ;;  %v3873_v60 = vadd.f32 %v3872_v5, %v3871_v42  ;;  %v3810_v54 = vpop.f32.mrb[102].mxu1  ;;  %v3874_v9 = vpop.f32.mrb[102].mxu0 }
 0x1f0   : > { %v3811_v3 = vpop.f32.mrb[103].mxu1  ;;  %v3875_v57 = vpop.f32.mrb[103].mxu0 }
 0x1f1   : > { %v2744_v15 = vadd.f32 %v3809_v8, %v5299_v35  ;;  %v3812_v58 = vadd.f32 %v3811_v3, %v3810_v54  ;;  %v3876_v7 = vadd.f32 %v3875_v57, %v3874_v9 }
 0x1f3   : > { %v5347_v53 = vadd.f32 %v3873_v60, %v2744_v15  ;;  %v2747_v16 = vadd.f32 %v3812_v58, %v5302_v38 }
 0x1f5   : > { %v5350_v63 = vadd.f32 %v3876_v7, %v2747_v16  ;;  %v3813_v22 = vpop.f32.mrb[104].mxu1  ;;  %v3877_v0 = vpop.f32.mrb[104].mxu0 }
 0x1f6   : > { %v3814_v61 = vpop.f32.mrb[105].mxu1  ;;  %v3878_v24 = vpop.f32.mrb[105].mxu0 }
 0x1f7   : > { %v3815_v44 = vadd.f32 %v3814_v61, %v3813_v22  ;;  %v3879_v6 = vadd.f32 %v3878_v24, %v3877_v0  ;;  %v3816_v13 = vpop.f32.mrb[106].mxu1  ;;  %v3880_v27 = vpop.f32.mrb[106].mxu0 }
 0x1f8   : > { %v3817_v4 = vpop.f32.mrb[107].mxu1  ;;  %v3881_v14 = vpop.f32.mrb[107].mxu0 }
 0x1f9   : > { %v2752_v35 = vadd.f32 %v3815_v44, %v5305_v55  ;;  %v3818_v36 = vadd.f32 %v3817_v4, %v3816_v13  ;;  %v3882_v32 = vadd.f32 %v3881_v14, %v3880_v27 }
 0x1fb   : > { %v5353_v19 = vadd.f32 %v3879_v6, %v2752_v35  ;;  %v2755_v38 = vadd.f32 %v3818_v36, %v5308_v56 }
 0x1fd   : > { %v5358_v17 = vadd.f32 %v3882_v32, %v2755_v38  ;;  %v3819_v12 = vpop.f32.mrb[108].mxu1  ;;  %v3883_v18 = vpop.f32.mrb[108].mxu0 }
 0x1fe   : > { %v3820_v23 = vpop.f32.mrb[109].mxu1  ;;  %v3884_v52 = vpop.f32.mrb[109].mxu0 }
 0x1ff   : > { %v3821_v46 = vadd.f32 %v3820_v23, %v3819_v12  ;;  %v3885_v26 = vadd.f32 %v3884_v52, %v3883_v18  ;;  %v3822_v29 = vpop.f32.mrb[110].mxu1  ;;  %v3886_v48 = vpop.f32.mrb[110].mxu0 }
 0x200   : > { %v3823_v55 = vpop.f32.mrb[111].mxu1  ;;  %v3887_v51 = vpop.f32.mrb[111].mxu0 }
 0x201   : > { %v2760_v33 = vadd.f32 %v3821_v46, %v5311_v10  ;;  %v3824_v34 = vadd.f32 %v3823_v55, %v3822_v29  ;;  %v3888_v20 = vadd.f32 %v3887_v51, %v3886_v48 }
 0x203   : > { %v5361_v56 = vadd.f32 %v3885_v26, %v2760_v33  ;;  %v2763_v43 = vadd.f32 %v3824_v34, %v5314_v11 }
 0x205   : > { %v5364_v39 = vadd.f32 %v3888_v20, %v2763_v43  ;;  %v3905_v59 = vpop.f32.mrb[112].mxu1  ;;  %v3969_v40 = vpop.f32.mrb[112].mxu0 }
 0x206   : > { %v3906_v47 = vpop.f32.mrb[113].mxu1  ;;  %v3970_v62 = vpop.f32.mrb[113].mxu0 }
 0x207   : > { %v3907_v28 = vadd.f32 %v3906_v47, %v3905_v59  ;;  %v3971_v42 = vadd.f32 %v3970_v62, %v3969_v40  ;;  %v3908_v45 = vpop.f32.mrb[114].mxu1  ;;  %v3972_v5 = vpop.f32.mrb[114].mxu0 }
 0x208   : > { %v3909_v8 = vpop.f32.mrb[115].mxu1  ;;  %v3973_v10 = vpop.f32.mrb[115].mxu0 }
 0x209   : > { %v2898_v60 = vadd.f32 %v3907_v28, %v5317_v30  ;;  %v3910_v54 = vadd.f32 %v3909_v8, %v3908_v45  ;;  %v3974_v9 = vadd.f32 %v3973_v10, %v3972_v5 }
 0x20b   : > { %v2995_v11 = vadd.f32 %v3971_v42, %v2898_v60  ;;  %v2901_v3 = vadd.f32 %v3910_v54, %v5320_v31 }
 0x20d   : > { %3058 = vst.msk [vmem:[%s5370_s16] sm:$0xff] %vm3057_vm0, %v2995_v11  ;;  %v2998_v57 = vadd.f32 %v3974_v9, %v2901_v3  ;;  %v3911_v15 = vpop.f32.mrb[116].mxu1  ;;  %v3975_v58 = vpop.f32.mrb[116].mxu0 }
 0x20e   : > { %v3912_v30 = vpop.f32.mrb[117].mxu1  ;;  %v3976_v7 = vpop.f32.mrb[117].mxu0 }
 0x20f   : > { %3059 = vst.msk [vmem:[%s5370_s16 + $0x8] sm:$0xff] %vm3057_vm0, %v2998_v57  ;;  %v3913_v16 = vadd.f32 %v3912_v30, %v3911_v15  ;;  %v3977_v22 = vadd.f32 %v3976_v7, %v3975_v58  ;;  %v3914_v0 = vpop.f32.mrb[118].mxu1  ;;  %v3978_v61 = vpop.f32.mrb[118].mxu0 }
 0x210   : > { %v3915_v24 = vpop.f32.mrb[119].mxu1  ;;  %v3979_v44 = vpop.f32.mrb[119].mxu0 }
 0x211   : > { %v2906_v6 = vadd.f32 %v3913_v16, %v5323_v49  ;;  %v3916_v31 = vadd.f32 %v3915_v24, %v3914_v0  ;;  %v3980_v13 = vadd.f32 %v3979_v44, %v3978_v61 }
 0x213   : > { %v3003_v27 = vadd.f32 %v3977_v22, %v2906_v6  ;;  %v2909_v4 = vadd.f32 %v3916_v31, %v5326_v50 }
 0x215   : > { %3060 = vst.msk [vmem:[%s5370_s16 + $0x10] sm:$0xff] %vm3057_vm0, %v3003_v27  ;;  %v3006_v14 = vadd.f32 %v3980_v13, %v2909_v4  ;;  %v3917_v35 = vpop.f32.mrb[120].mxu1  ;;  %v3981_v36 = vpop.f32.mrb[120].mxu0 }
 0x216   : > { %v3918_v32 = vpop.f32.mrb[121].mxu1  ;;  %v3982_v38 = vpop.f32.mrb[121].mxu0 }
 0x217   : > { %3061 = vst.msk [vmem:[%s5370_s16 + $0x18] sm:$0xff] %vm3057_vm0, %v3006_v14  ;;  %v3919_v12 = vadd.f32 %v3918_v32, %v3917_v35  ;;  %v3983_v18 = vadd.f32 %v3982_v38, %v3981_v36  ;;  %v3920_v23 = vpop.f32.mrb[122].mxu1  ;;  %v3984_v49 = vpop.f32.mrb[122].mxu0 }
 0x218   : > { %v3921_v52 = vpop.f32.mrb[123].mxu1  ;;  %v3985_v46 = vpop.f32.mrb[123].mxu0 }
 0x219   : > { %v2914_v26 = vadd.f32 %v3919_v12, %v5329_v1  ;;  %v3922_v50 = vadd.f32 %v3921_v52, %v3920_v23  ;;  %v3986_v29 = vadd.f32 %v3985_v46, %v3984_v49 }
 0x21b   : > { %v3011_v48 = vadd.f32 %v3983_v18, %v2914_v26  ;;  %v2917_v55 = vadd.f32 %v3922_v50, %v5332_v2 }
 0x21d   : > { %3062 = vst.msk [vmem:[%s5370_s16 + $0x20] sm:$0xff] %vm3057_vm0, %v3011_v48  ;;  %v3014_v51 = vadd.f32 %v3986_v29, %v2917_v55  ;;  %v3923_v33 = vpop.f32.mrb[124].mxu1  ;;  %v3987_v34 = vpop.f32.mrb[124].mxu0 }
 0x21e   : > { %v3924_v20 = vpop.f32.mrb[125].mxu1  ;;  %v3988_v43 = vpop.f32.mrb[125].mxu0 }
 0x21f   : > { %3063 = vst.msk [vmem:[%s5370_s16 + $0x28] sm:$0xff] %vm3057_vm0, %v3014_v51  ;;  %v3925_v59 = vadd.f32 %v3924_v20, %v3923_v33  ;;  %v3989_v40 = vadd.f32 %v3988_v43, %v3987_v34  ;;  %v3926_v47 = vpop.f32.mrb[126].mxu1  ;;  %v3990_v1 = vpop.f32.mrb[126].mxu0 }
 0x220   : > { %v3927_v62 = vpop.f32.mrb[127].mxu1  ;;  %v3991_v28 = vpop.f32.mrb[127].mxu0 }
 0x221   : > { %v2922_v42 = vadd.f32 %v3925_v59, %v5335_v21  ;;  %v3928_v2 = vadd.f32 %v3927_v62, %v3926_v47  ;;  %v3992_v45 = vadd.f32 %v3991_v28, %v3990_v1 }
 0x223   : > { %v3019_v5 = vadd.f32 %v3989_v40, %v2922_v42  ;;  %v2925_v8 = vadd.f32 %v3928_v2, %v5338_v25 }
 0x225   : > { %3064 = vst.msk [vmem:[%s5370_s16 + $0x30] sm:$0xff] %vm3057_vm0, %v3019_v5  ;;  %v3022_v10 = vadd.f32 %v3992_v45, %v2925_v8  ;;  %v3929_v60 = vpop.f32.mrb[128].mxu1  ;;  %v3993_v54 = vpop.f32.mrb[128].mxu0 }
 0x226   : > { %v3930_v9 = vpop.f32.mrb[129].mxu1  ;;  %v3994_v11 = vpop.f32.mrb[129].mxu0 }
 0x227   : > { %3065 = vst.msk [vmem:[%s5370_s16 + $0x38] sm:$0xff] %vm3057_vm0, %v3022_v10  ;;  %v3931_v3 = vadd.f32 %v3930_v9, %v3929_v60  ;;  %v3995_v57 = vadd.f32 %v3994_v11, %v3993_v54  ;;  %v3932_v15 = vpop.f32.mrb[130].mxu1  ;;  %v3996_v21 = vpop.f32.mrb[130].mxu0 }
 0x228   : > { %v3933_v58 = vpop.f32.mrb[131].mxu1  ;;  %v3997_v30 = vpop.f32.mrb[131].mxu0 }
 0x229   : > { %v2930_v7 = vadd.f32 %v3931_v3, %v5341_v37  ;;  %v3934_v25 = vadd.f32 %v3933_v58, %v3932_v15  ;;  %v3998_v16 = vadd.f32 %v3997_v30, %v3996_v21 }
 0x22b   : > { %v3027_v22 = vadd.f32 %v3995_v57, %v2930_v7  ;;  %v2933_v0 = vadd.f32 %v3934_v25, %v5344_v41 }
 0x22d   : > { %3066 = vst.msk [vmem:[%s5370_s16 + $0x40] sm:$0xff] %vm3057_vm0, %v3027_v22  ;;  %v3030_v61 = vadd.f32 %v3998_v16, %v2933_v0  ;;  %v3935_v24 = vpop.f32.mrb[132].mxu1  ;;  %v3999_v44 = vpop.f32.mrb[132].mxu0 }
 0x22e   : > { %v3936_v6 = vpop.f32.mrb[133].mxu1  ;;  %v4000_v31 = vpop.f32.mrb[133].mxu0 }
 0x22f   : > { %3067 = vst.msk [vmem:[%s5370_s16 + $0x48] sm:$0xff] %vm3057_vm0, %v3030_v61  ;;  %v3937_v13 = vadd.f32 %v3936_v6, %v3935_v24  ;;  %v4001_v27 = vadd.f32 %v4000_v31, %v3999_v44  ;;  %v3938_v4 = vpop.f32.mrb[134].mxu1  ;;  %v4002_v37 = vpop.f32.mrb[134].mxu0 }
 0x230   : > { %v3939_v14 = vpop.f32.mrb[135].mxu1  ;;  %v4003_v35 = vpop.f32.mrb[135].mxu0 }
 0x231   : > { %v2938_v36 = vadd.f32 %v3937_v13, %v5347_v53  ;;  %v3940_v41 = vadd.f32 %v3939_v14, %v3938_v4  ;;  %v4004_v32 = vadd.f32 %v4003_v35, %v4002_v37 }
 0x233   : > { %v3035_v38 = vadd.f32 %v4001_v27, %v2938_v36  ;;  %v2941_v12 = vadd.f32 %v3940_v41, %v5350_v63 }
 0x235   : > { %3068 = vst.msk [vmem:[%s5370_s16 + $0x50] sm:$0xff] %vm3057_vm0, %v3035_v38  ;;  %v3038_v18 = vadd.f32 %v4004_v32, %v2941_v12  ;;  %v3941_v23 = vpop.f32.mrb[136].mxu1  ;;  %v4005_v49 = vpop.f32.mrb[136].mxu0 }
 0x236   : > { %v3942_v52 = vpop.f32.mrb[137].mxu1  ;;  %v4006_v46 = vpop.f32.mrb[137].mxu0 }
 0x237   : > { %3069 = vst.msk [vmem:[%s5370_s16 + $0x58] sm:$0xff] %vm3057_vm0, %v3038_v18  ;;  %v3943_v26 = vadd.f32 %v3942_v52, %v3941_v23  ;;  %v4007_v50 = vadd.f32 %v4006_v46, %v4005_v49  ;;  %v3944_v29 = vpop.f32.mrb[138].mxu1  ;;  %v4008_v53 = vpop.f32.mrb[138].mxu0 }
 0x238   : > { %v3945_v48 = vpop.f32.mrb[139].mxu1  ;;  %v4009_v55 = vpop.f32.mrb[139].mxu0 }
 0x239   : > { %v2946_v51 = vadd.f32 %v3943_v26, %v5353_v19  ;;  %v3946_v63 = vadd.f32 %v3945_v48, %v3944_v29  ;;  %v4010_v33 = vadd.f32 %v4009_v55, %v4008_v53 }
 0x23b   : > { %v3043_v34 = vadd.f32 %v4007_v50, %v2946_v51  ;;  %v2949_v20 = vadd.f32 %v3946_v63, %v5358_v17 }
 0x23d   : > { %3070 = vst.msk [vmem:[%s5370_s16 + $0x60] sm:$0xff] %vm3057_vm0, %v3043_v34  ;;  %v3046_v43 = vadd.f32 %v4010_v33, %v2949_v20  ;;  %v3947_v59 = vpop.f32.mrb[140].mxu1  ;;  %v4011_v40 = vpop.f32.mrb[140].mxu0 }
 0x23e   : > { %v3948_v47 = vpop.f32.mrb[141].mxu1  ;;  %v4012_v1 = vpop.f32.mrb[141].mxu0 }
 0x23f   : > { %3071 = vst.msk [vmem:[%s5370_s16 + $0x68] sm:$0xff] %vm3057_vm0, %v3046_v43  ;;  %v3949_v62 = vadd.f32 %v3948_v47, %v3947_v59  ;;  %v4013_v28 = vadd.f32 %v4012_v1, %v4011_v40  ;;  %v3950_v42 = vpop.f32.mrb[142].mxu1  ;;  %v4014_v19 = vpop.f32.mrb[142].mxu0 }
 0x240   : > { %v3951_v2 = vpop.f32.mrb[143].mxu1  ;;  %v4015_v45 = vpop.f32.mrb[143].mxu0 }
 0x241   : > { %v2954_v5 = vadd.f32 %v3949_v62, %v5361_v56  ;;  %v3952_v17 = vadd.f32 %v3951_v2, %v3950_v42  ;;  %v4016_v8 = vadd.f32 %v4015_v45, %v4014_v19 }
 0x243   : > { %v3051_v10 = vadd.f32 %v4013_v28, %v2954_v5  ;;  %v2957_v60 = vadd.f32 %v3952_v17, %v5364_v39 }
 0x245   : > { %3072 = vst.msk [vmem:[%s5370_s16 + $0x70] sm:$0xff] %vm3057_vm0, %v3051_v10  ;;  %v3054_v54 = vadd.f32 %v4016_v8, %v2957_v60 }
 0x247   : > { %3073 = vst.msk [vmem:[%s5370_s16 + $0x78] sm:$0xff] %vm3057_vm0, %v3054_v54 }
 0x248 PF: > { %p12_p8 = scmp.ge.s32.totalorder %s4541_s14, 5   ;;  %s5438_s9 = smov %s4493_s10 }
 0x249   : > { %s5439_s10 = smov %s4497_s11  ;;  %s5440_s11 = smov %s4551_s17 }
 0x24a   : > { %s5441_s12 = smov %s4541_s14  ;;  %14 = sbr.rel (!%p12_p8) target bundleno = 3 (0x3), region = 68 }
 0x251   :  { %3096 = vsyncpa [#allocation3], 1 }
 0x252   :  { %3098 = vsyncpa [#allocation3 + $0x1], 1 }

</bundles_post_ra>
